<compile_context>
chip_gen: v5e
topology: v5e:2x2
jax: 0.10.0
libtpu: 0.0.40
codegen_flags: <defaults>
</compile_context>

<pallas_src>
import functools

import numpy as np
import jax
import jax.numpy as jnp
from jax import lax
from jax.experimental import pallas as pl
from jax.experimental.pallas import tpu as pltpu

# Branch kernel sizes / paddings (module-level globals in the original file).
K2, P2 = 3, 1
K3, P3 = 5, 2
K4, P4 = 7, 3
BRANCHES = ((K2, P2), (K3, P3), (K4, P4))
BN_EPS = 1e-5
LANE = 128

_CompilerParams = getattr(pltpu, "CompilerParams",
                          getattr(pltpu, "TPUCompilerParams", None))


def _vmem_limit_bytes():
    """Generation-aware scoped-VMEM budget (~75% of physical capacity)."""
    try:
        cap = int(pltpu.get_tpu_info().vmem_capacity_bytes)
    except Exception:
        cap = 64 * 1024 * 1024          # conservative default (v7x per-TC size)
    return int(cap * 3 // 4)


# ---------------------------------------------------------------------------
# Parameter packing (done once, outside the jitted forward)
# ---------------------------------------------------------------------------
def _bn_fold(bn):
    scale = bn["gamma"] / jnp.sqrt(bn["var"] + BN_EPS)
    shift = bn["beta"] - bn["mean"] * scale
    return scale.astype(jnp.float32), shift.astype(jnp.float32)


def _pack_branch_weights(ws, c_in, c_out):
    """Pack the 3 branch conv weights into one (K4, C_out, c_in) tensor.

    Tap t is the absolute offset into the max-padded (P4) input: output
    position l of a branch with (K, p) reads x_pad[l*stride + t] for
    t in [P4-p, P4-p+K).  Branches with fewer taps get zero slices, so all
    three branches collapse into K4 per-tap matmuls against one weight tensor
    (no channel-concatenate anywhere).
    """
    c_b = c_out // 3
    w_full = jnp.zeros((K4, c_out, c_in), jnp.float32)
    for j, ((k, p), wkey) in enumerate(zip(BRANCHES, ("w2", "w3", "w4"))):
        wj = jnp.transpose(ws[wkey], (2, 0, 1))              # (K, C_b, c_in)
        w_full = w_full.at[P4 - p:P4 - p + k, j * c_b:(j + 1) * c_b, :].set(wj)
    return w_full


def prepare_block_params(p, in_ch, out_ch):
    """One-time packing of module parameters into kernel operands."""
    s1, t1 = _bn_fold(p["bn1"])
    s2, t2 = _bn_fold(p["bn2"])
    packed = {
        "w1": _pack_branch_weights(p["bc1"], in_ch, out_ch).astype(jnp.bfloat16),
        "w2": _pack_branch_weights(p["bc2"], out_ch, out_ch).astype(jnp.bfloat16),
        "s1": s1.reshape(out_ch, 1), "t1": t1.reshape(out_ch, 1),
        "s2": s2.reshape(out_ch, 1), "t2": t2.reshape(out_ch, 1),
        "sew1t": p["se_w1"].T.astype(jnp.float32),            # (C_out, H)
        "sew2": p["se_w2"].astype(jnp.float32),                # (C_out, H)
    }
    if in_ch != out_ch:
        ssc, tsc = _bn_fold(p["shut_bn"])
        wsc = p["shut_w"][:, :, 0].astype(jnp.float32)         # (C_out, C_in)
        packed["wsc"] = ssc[:, None] * wsc                     # fold ShutBN scale
        packed["tsc"] = (ssc * p["shut_b"] + tsc).reshape(out_ch, 1)
    return packed


# ---------------------------------------------------------------------------
# Fused kernel (one grid step == one sample)
# ---------------------------------------------------------------------------
def _make_kernel(*, c_in, c_out, stride, l_in, l1, l_pad, has_proj):
    inv_l1 = 1.0 / float(l1)

    def kernel(xph_ref, w1_ref, w2_ref, s1_ref, t1_ref, s2_ref, t2_ref,
               sw1_ref, sw2_ref, *rest):
        if has_proj:
            wsc_ref, tsc_ref, o_ref = rest
        else:
            (o_ref,) = rest

        # Hoisted lane indices (JAX does not CSE broadcast_in_dim).
        lane = lax.broadcasted_iota(jnp.int32, (c_out, l_pad), 1)

        # ---- BranchConv1D #1 (stride S): shift-and-accumulate over taps -----
        # Output position l of tap t reads x_padP4[l*stride + t], i.e. phase
        # t % stride of the decomposed input at lane offset t // stride.
        op = None
        for t in range(K4):
            ph, q = t % stride, t // stride
            rhs = xph_ref[ph, :, q:q + l_pad].astype(jnp.bfloat16)   # (C_in, Lp)
            part = jnp.dot(w1_ref[t], rhs, preferred_element_type=jnp.float32)
            op = part if op is None else op + part
        # BN1 (eval, folded) + ReLU.  Dropout is identity in eval mode.
        op = jnp.maximum(op * s1_ref[...] + t1_ref[...], 0.0)        # (C_out, Lp)

        # ---- BranchConv1D #2 (stride 1): shift-and-accumulate over taps -----
        # Tap t reads op[:, l + t - P4]; realised as an XLU lane-roll of the
        # resident activation plus a mask for the zero-padded boundaries.
        acc = None
        for t in range(K4):
            s = t - P4
            shifted = op if s == 0 else pltpu.roll(op, shift=(-s) % l_pad, axis=1)
            valid = (lane + s >= 0) & (lane + s < l1)
            rhs = jnp.where(valid, shifted, 0.0).astype(jnp.bfloat16)
            part = jnp.dot(w2_ref[t], rhs, preferred_element_type=jnp.float32)
            acc = part if acc is None else acc + part
        op = acc * s2_ref[...] + t2_ref[...]                  # BN2 (no ReLU)

        # ---- SELayer1D (VPU/XLU; pad lanes masked out of the mean) ----------
        pooled = jnp.sum(jnp.where(lane < l1, op, 0.0), axis=1,
                         keepdims=True) * inv_l1              # (C_out, 1)
        hid = jnp.maximum(
            jnp.sum(sw1_ref[...] * pooled, axis=0, keepdims=True), 0.0)  # (1, H)
        alpha = jax.nn.sigmoid(
            jnp.sum(sw2_ref[...] * hid, axis=1, keepdims=True))          # (C_out,1)
        op = op * alpha

        # ---- shortcut: MaxPool(ceil) [+ ShutConv 1x1 + ShutBN], all f32 -----
        if stride == 1:
            sc = xph_ref[0, :, P4:P4 + l_pad]
        else:
            lane_in = lax.broadcasted_iota(jnp.int32, (c_in, l_pad), 1)
            sc = None
            for s in range(stride):
                ph, q = (P4 + s) % stride, (P4 + s) // stride
                piece = xph_ref[ph, :, q:q + l_pad]           # (C_in, Lp)
                if (l1 - 1) * stride + s >= l_in:
                    # ceil-mode partial last window: padding must not win the max
                    piece = jnp.where(lane_in == l1 - 1, -jnp.inf, piece)
                sc = piece if sc is None else jnp.maximum(sc, piece)
        if has_proj:                                          # ShutConv(1x1)+ShutBN
            sc = jnp.dot(wsc_ref[...], sc,
                         preferred_element_type=jnp.float32) + tsc_ref[...]

        # ---- residual add + ReLU, lane-dense store ---------------------------
        o_ref[0] = jnp.maximum(op + sc, 0.0)

    return kernel


def _const_spec(a):
    nd = a.ndim
    return pl.BlockSpec(a.shape, lambda b, _nd=nd: (0,) * _nd)


def basic_block_forward(x, packed, *, in_ch, out_ch, stride):
    n, c_in, l_in = x.shape
    assert c_in == in_ch and out_ch % 3 == 0
    l1 = (l_in + 2 * P2 - K2) // stride + 1      # same for all branches (k = 2p+1)
    assert l1 == -(-l_in // stride)              # == ceil-mode MaxPool length
    has_proj = in_ch != out_ch
    l_pad = -(-l1 // LANE) * LANE                # lane-dense (multiple of 128)

    # Phase-decompose the zero-padded input so every conv tap / max-pool window
    # is a contiguous (static) lane slice of the VMEM ref: single copy of x in
    # HBM, no in-kernel strided loads, no im2col replication anywhere.
    offs = [t // stride for t in range(K4)]
    offs += [P4] if stride == 1 else [(P4 + s) // stride for s in range(stride)]
    l_ph = max(offs) + l_pad
    right = stride * l_ph - l_in - P4
    assert right >= 0
    xpad = jnp.pad(x.astype(jnp.float32), ((0, 0), (0, 0), (P4, right)))
    xph = (xpad.reshape(n, c_in, l_ph, stride)
               .transpose(0, 3, 1, 2)            # (N, S, C_in, L_ph)
               .reshape(n * stride, c_in, l_ph))

    kernel = _make_kernel(c_in=c_in, c_out=out_ch, stride=stride,
                          l_in=l_in, l1=l1, l_pad=l_pad, has_proj=has_proj)

    params = [packed["w1"], packed["w2"], packed["s1"], packed["t1"],
              packed["s2"], packed["t2"], packed["sew1t"], packed["sew2"]]
    if has_proj:
        params += [packed["wsc"], packed["tsc"]]

    in_specs = [pl.BlockSpec((stride, c_in, l_ph), lambda b: (b, 0, 0))]
    in_specs += [_const_spec(a) for a in params]   # weights stay VMEM-resident

    out = pl.pallas_call(
        kernel,
        out_shape=jax.ShapeDtypeStruct((n, out_ch, l_pad), jnp.float32),
        grid=(n,),
        in_specs=in_specs,
        out_specs=pl.BlockSpec((1, out_ch, l_pad), lambda b: (b, 0, 0)),
        compiler_params=_CompilerParams(
            dimension_semantics=("parallel",),
            vmem_limit_bytes=_vmem_limit_bytes()),
    )(xph, *params)

    return out[:, :, :l1]            # drop the lane padding


# ---------------------------------------------------------------------------
# Deterministic synthetic parameters
# ---------------------------------------------------------------------------
def init_bn(key, c):
    k1, k2, k3, k4 = jax.random.split(key, 4)
    return {
        "gamma": jax.random.uniform(k1, (c,), minval=0.5, maxval=1.5),
        "beta": 0.1 * jax.random.normal(k2, (c,)),
        "mean": 0.1 * jax.random.normal(k3, (c,)),
        "var": jax.random.uniform(k4, (c,), minval=0.5, maxval=1.5),
    }


def init_params(key, in_ch, out_ch, reduction=16):
    C = out_ch // 3
    H = out_ch // reduction
    ks = jax.random.split(key, 13)
    w = lambda k, shape: 0.1 * jax.random.normal(k, shape, dtype=jnp.float32)
    return {
        "bc1": {"w2": w(ks[0], (C, in_ch, K2)),
                "w3": w(ks[1], (C, in_ch, K3)),
                "w4": w(ks[2], (C, in_ch, K4))},
        "bn1": init_bn(ks[3], out_ch),
        "bc2": {"w2": w(ks[4], (C, out_ch, K2)),
                "w3": w(ks[5], (C, out_ch, K3)),
                "w4": w(ks[6], (C, out_ch, K4))},
        "bn2": init_bn(ks[7], out_ch),
        "se_w1": w(ks[8], (H, out_ch)),
        "se_w2": w(ks[9], (out_ch, H)),
        "shut_w": w(ks[10], (out_ch, in_ch, 1)),
        "shut_b": 0.1 * jax.random.normal(ks[11], (out_ch,), dtype=jnp.float32),
        "shut_bn": init_bn(ks[12], out_ch),
    }


# ---------------------------------------------------------------------------
# Pure-JAX reference (numerical verification; branch convs at matched bf16)
# ---------------------------------------------------------------------------
def _conv1d_ref(x, w, stride, padding, *, cast_bf16, bias=None):
    if cast_bf16:
        x = x.astype(jnp.bfloat16)
        w = w.astype(jnp.bfloat16)
    out = lax.conv_general_dilated(
        x, w, window_strides=(stride,), padding=[(padding, padding)],
        dimension_numbers=("NCH", "OIH", "NCH"),
        preferred_element_type=jnp.float32)
    if bias is not None:
        out = out + bias.reshape(1, -1, 1)
    return out


def _bn_ref(v, bn):
    s, t = _bn_fold(bn)
    return v * s.reshape(1, -1, 1) + t.reshape(1, -1, 1)


def forward_ref(x, p, in_ch, out_ch, stride):
    def branch(v, ws, s):
        return jnp.concatenate(
            [_conv1d_ref(v, ws["w2"], s, P2, cast_bf16=True),
             _conv1d_ref(v, ws["w3"], s, P3, cast_bf16=True),
             _conv1d_ref(v, ws["w4"], s, P4, cast_bf16=True)], axis=1)

    op = jnp.maximum(_bn_ref(branch(x, p["bc1"], stride), p["bn1"]), 0.0)
    op = _bn_ref(branch(op, p["bc2"], 1), p["bn2"])
    alpha = jnp.mean(op, axis=-1)                            # (N, C)
    hid = jnp.maximum(alpha @ p["se_w1"].T, 0.0)
    alpha = jax.nn.sigmoid(hid @ p["se_w2"].T)
    op = op * alpha[:, :, None]

    sc = x.astype(jnp.float32)
    if stride != 1:
        n, c, l = sc.shape
        lo = -(-l // stride)
        sc = jnp.pad(sc, ((0, 0), (0, 0), (0, lo * stride - l)),
                     constant_values=-jnp.inf)
        sc = jnp.max(sc.reshape(n, c, lo, stride), axis=-1)
    if in_ch != out_ch:
        sc = _conv1d_ref(sc, p["shut_w"], 1, 0, cast_bf16=False, bias=p["shut_b"])
        sc = _bn_ref(sc, p["shut_bn"])
    return jnp.maximum(op + sc, 0.0)


# ---------------------------------------------------------------------------
if __name__ == "__main__":
    N, C_IN, L = 2, 4, 16
    C_OUT, STRIDE = 48, 2            # 48 % 3 == 0, SE hidden = 48 // 16 = 3
    # drop_out_rate is irrelevant in eval mode (Dropout == identity)

    key = jax.random.PRNGKey(0)
    kx, kp = jax.random.split(key)
    x = jax.random.normal(kx, (N, C_IN, L), dtype=jnp.float32)
    params = init_params(kp, C_IN, C_OUT)
    packed = prepare_block_params(params, C_IN, C_OUT)

    fwd = jax.jit(functools.partial(basic_block_forward,
                                    in_ch=C_IN, out_ch=C_OUT, stride=STRIDE))
    out = jax.block_until_ready(fwd(x, packed))

    ref = jax.block_until_ready(forward_ref(x, params, C_IN, C_OUT, STRIDE))
    assert out.shape == (N, C_OUT, -(-L // STRIDE))
    np.testing.assert_allclose(np.asarray(out), np.asarray(ref),
                               rtol=1e-2, atol=1e-2)
    print("KERNEL_OK")
</pallas_src>

<mosaic_0001>
module attributes {stable_mosaic.version = 11 : i64} {
  func.func @kernel(%arg0: i32, %arg1: memref<2x4x131xf32, #tpu.memory_space<vmem>>, %arg2: memref<7x48x4xbf16, #tpu.memory_space<vmem>>, %arg3: memref<7x48x48xbf16, #tpu.memory_space<vmem>>, %arg4: memref<48x1xf32, #tpu.memory_space<vmem>>, %arg5: memref<48x1xf32, #tpu.memory_space<vmem>>, %arg6: memref<48x1xf32, #tpu.memory_space<vmem>>, %arg7: memref<48x1xf32, #tpu.memory_space<vmem>>, %arg8: memref<48x3xf32, #tpu.memory_space<vmem>>, %arg9: memref<48x3xf32, #tpu.memory_space<vmem>>, %arg10: memref<48x4xf32, #tpu.memory_space<vmem>>, %arg11: memref<48x1xf32, #tpu.memory_space<vmem>>, %arg12: memref<1x48x128xf32, #tpu.memory_space<vmem>>) attributes {dimension_semantics = [#tpu.dimension_semantics<parallel>], iteration_bounds = array<i64: 2>, scalar_prefetch = 0 : i64, scratch_operands = 0 : i64, tpu.core_type = #tpu.core_type<tc>, window_params = [{transform_indices = @transform_0, window_bounds = array<i64: 2, 4, 131>}, {pipeline_mode = #tpu.pipeline_mode<synchronous>, transform_indices = @transform_1, window_bounds = array<i64: 7, 48, 4>}, {pipeline_mode = #tpu.pipeline_mode<synchronous>, transform_indices = @transform_2, window_bounds = array<i64: 7, 48, 48>}, {pipeline_mode = #tpu.pipeline_mode<synchronous>, transform_indices = @transform_3, window_bounds = array<i64: 48, 1>}, {pipeline_mode = #tpu.pipeline_mode<synchronous>, transform_indices = @transform_4, window_bounds = array<i64: 48, 1>}, {pipeline_mode = #tpu.pipeline_mode<synchronous>, transform_indices = @transform_5, window_bounds = array<i64: 48, 1>}, {pipeline_mode = #tpu.pipeline_mode<synchronous>, transform_indices = @transform_6, window_bounds = array<i64: 48, 1>}, {pipeline_mode = #tpu.pipeline_mode<synchronous>, transform_indices = @transform_7, window_bounds = array<i64: 48, 3>}, {pipeline_mode = #tpu.pipeline_mode<synchronous>, transform_indices = @transform_8, window_bounds = array<i64: 48, 3>}, {pipeline_mode = #tpu.pipeline_mode<synchronous>, transform_indices = @transform_9, window_bounds = array<i64: 48, 4>}, {pipeline_mode = #tpu.pipeline_mode<synchronous>, transform_indices = @transform_10, window_bounds = array<i64: 48, 1>}, {transform_indices = @transform_11, window_bounds = array<i64: 1, 48, 128>}]} {
    %0 = tpu.iota {dimensions = array<i32: 1>} : vector<48x128xi32>
    %c0 = arith.constant 0 : index
    %c0_0 = arith.constant 0 : index
    %c0_1 = arith.constant 0 : index
    %1 = vector.load %arg1[%c0, %c0_0, %c0_1] : memref<2x4x131xf32, #tpu.memory_space<vmem>>, vector<1x4x128xf32>
    %2 = vector.shape_cast %1 : vector<1x4x128xf32> to vector<4x128xf32>
    %3 = arith.truncf %2 : vector<4x128xf32> to vector<4x128xbf16>
    %c0_2 = arith.constant 0 : index
    %c0_3 = arith.constant 0 : index
    %c0_4 = arith.constant 0 : index
    %4 = vector.load %arg2[%c0_2, %c0_3, %c0_4] : memref<7x48x4xbf16, #tpu.memory_space<vmem>>, vector<1x48x4xbf16>
    %5 = vector.shape_cast %4 : vector<1x48x4xbf16> to vector<48x4xbf16>
    %cst = arith.constant dense<0.000000e+00> : vector<48x128xf32>
    %6 = tpu.matmul %5, %3, %cst {dimension_numbers = #tpu.dot_dimension_numbers<[1], [0], [0], [1], [0, 0, 1, 1], [], []>} : vector<48x4xbf16>, vector<4x128xbf16>, vector<48x128xf32> -> vector<48x128xf32>
    %c1 = arith.constant 1 : index
    %c0_5 = arith.constant 0 : index
    %c0_6 = arith.constant 0 : index
    %7 = vector.load %arg1[%c1, %c0_5, %c0_6] : memref<2x4x131xf32, #tpu.memory_space<vmem>>, vector<1x4x128xf32>
    %8 = vector.shape_cast %7 : vector<1x4x128xf32> to vector<4x128xf32>
    %9 = arith.truncf %8 : vector<4x128xf32> to vector<4x128xbf16>
    %c1_7 = arith.constant 1 : index
    %c0_8 = arith.constant 0 : index
    %c0_9 = arith.constant 0 : index
    %10 = vector.load %arg2[%c1_7, %c0_8, %c0_9] : memref<7x48x4xbf16, #tpu.memory_space<vmem>>, vector<1x48x4xbf16>
    %11 = vector.shape_cast %10 : vector<1x48x4xbf16> to vector<48x4xbf16>
    %cst_10 = arith.constant dense<0.000000e+00> : vector<48x128xf32>
    %12 = tpu.matmul %11, %9, %cst_10 {dimension_numbers = #tpu.dot_dimension_numbers<[1], [0], [0], [1], [0, 0, 1, 1], [], []>} : vector<48x4xbf16>, vector<4x128xbf16>, vector<48x128xf32> -> vector<48x128xf32>
    %13 = arith.addf %6, %12 : vector<48x128xf32>
    %c0_11 = arith.constant 0 : index
    %c0_12 = arith.constant 0 : index
    %c1_13 = arith.constant 1 : index
    %14 = vector.load %arg1[%c0_11, %c0_12, %c1_13] : memref<2x4x131xf32, #tpu.memory_space<vmem>>, vector<1x4x128xf32>
    %15 = vector.shape_cast %14 : vector<1x4x128xf32> to vector<4x128xf32>
    %16 = arith.truncf %15 : vector<4x128xf32> to vector<4x128xbf16>
    %c2 = arith.constant 2 : index
    %c0_14 = arith.constant 0 : index
    %c0_15 = arith.constant 0 : index
    %17 = vector.load %arg2[%c2, %c0_14, %c0_15] : memref<7x48x4xbf16, #tpu.memory_space<vmem>>, vector<1x48x4xbf16>
    %18 = vector.shape_cast %17 : vector<1x48x4xbf16> to vector<48x4xbf16>
    %cst_16 = arith.constant dense<0.000000e+00> : vector<48x128xf32>
    %19 = tpu.matmul %18, %16, %cst_16 {dimension_numbers = #tpu.dot_dimension_numbers<[1], [0], [0], [1], [0, 0, 1, 1], [], []>} : vector<48x4xbf16>, vector<4x128xbf16>, vector<48x128xf32> -> vector<48x128xf32>
    %20 = arith.addf %13, %19 : vector<48x128xf32>
    %c1_17 = arith.constant 1 : index
    %c0_18 = arith.constant 0 : index
    %c1_19 = arith.constant 1 : index
    %21 = vector.load %arg1[%c1_17, %c0_18, %c1_19] : memref<2x4x131xf32, #tpu.memory_space<vmem>>, vector<1x4x128xf32>
    %22 = vector.shape_cast %21 : vector<1x4x128xf32> to vector<4x128xf32>
    %23 = arith.truncf %22 : vector<4x128xf32> to vector<4x128xbf16>
    %c3 = arith.constant 3 : index
    %c0_20 = arith.constant 0 : index
    %c0_21 = arith.constant 0 : index
    %24 = vector.load %arg2[%c3, %c0_20, %c0_21] : memref<7x48x4xbf16, #tpu.memory_space<vmem>>, vector<1x48x4xbf16>
    %25 = vector.shape_cast %24 : vector<1x48x4xbf16> to vector<48x4xbf16>
    %cst_22 = arith.constant dense<0.000000e+00> : vector<48x128xf32>
    %26 = tpu.matmul %25, %23, %cst_22 {dimension_numbers = #tpu.dot_dimension_numbers<[1], [0], [0], [1], [0, 0, 1, 1], [], []>} : vector<48x4xbf16>, vector<4x128xbf16>, vector<48x128xf32> -> vector<48x128xf32>
    %27 = arith.addf %20, %26 : vector<48x128xf32>
    %c0_23 = arith.constant 0 : index
    %c0_24 = arith.constant 0 : index
    %c2_25 = arith.constant 2 : index
    %28 = vector.load %arg1[%c0_23, %c0_24, %c2_25] : memref<2x4x131xf32, #tpu.memory_space<vmem>>, vector<1x4x128xf32>
    %29 = vector.shape_cast %28 : vector<1x4x128xf32> to vector<4x128xf32>
    %30 = arith.truncf %29 : vector<4x128xf32> to vector<4x128xbf16>
    %c4 = arith.constant 4 : index
    %c0_26 = arith.constant 0 : index
    %c0_27 = arith.constant 0 : index
    %31 = vector.load %arg2[%c4, %c0_26, %c0_27] : memref<7x48x4xbf16, #tpu.memory_space<vmem>>, vector<1x48x4xbf16>
    %32 = vector.shape_cast %31 : vector<1x48x4xbf16> to vector<48x4xbf16>
    %cst_28 = arith.constant dense<0.000000e+00> : vector<48x128xf32>
    %33 = tpu.matmul %32, %30, %cst_28 {dimension_numbers = #tpu.dot_dimension_numbers<[1], [0], [0], [1], [0, 0, 1, 1], [], []>} : vector<48x4xbf16>, vector<4x128xbf16>, vector<48x128xf32> -> vector<48x128xf32>
    %34 = arith.addf %27, %33 : vector<48x128xf32>
    %c1_29 = arith.constant 1 : index
    %c0_30 = arith.constant 0 : index
    %c2_31 = arith.constant 2 : index
    %35 = vector.load %arg1[%c1_29, %c0_30, %c2_31] : memref<2x4x131xf32, #tpu.memory_space<vmem>>, vector<1x4x128xf32>
    %36 = vector.shape_cast %35 : vector<1x4x128xf32> to vector<4x128xf32>
    %37 = arith.truncf %36 : vector<4x128xf32> to vector<4x128xbf16>
    %c5 = arith.constant 5 : index
    %c0_32 = arith.constant 0 : index
    %c0_33 = arith.constant 0 : index
    %38 = vector.load %arg2[%c5, %c0_32, %c0_33] : memref<7x48x4xbf16, #tpu.memory_space<vmem>>, vector<1x48x4xbf16>
    %39 = vector.shape_cast %38 : vector<1x48x4xbf16> to vector<48x4xbf16>
    %cst_34 = arith.constant dense<0.000000e+00> : vector<48x128xf32>
    %40 = tpu.matmul %39, %37, %cst_34 {dimension_numbers = #tpu.dot_dimension_numbers<[1], [0], [0], [1], [0, 0, 1, 1], [], []>} : vector<48x4xbf16>, vector<4x128xbf16>, vector<48x128xf32> -> vector<48x128xf32>
    %41 = arith.addf %34, %40 : vector<48x128xf32>
    %c0_35 = arith.constant 0 : index
    %c0_36 = arith.constant 0 : index
    %c3_37 = arith.constant 3 : index
    %42 = vector.load %arg1[%c0_35, %c0_36, %c3_37] : memref<2x4x131xf32, #tpu.memory_space<vmem>>, vector<1x4x128xf32>
    %43 = vector.shape_cast %42 : vector<1x4x128xf32> to vector<4x128xf32>
    %44 = arith.truncf %43 : vector<4x128xf32> to vector<4x128xbf16>
    %c6 = arith.constant 6 : index
    %c0_38 = arith.constant 0 : index
    %c0_39 = arith.constant 0 : index
    %45 = vector.load %arg2[%c6, %c0_38, %c0_39] : memref<7x48x4xbf16, #tpu.memory_space<vmem>>, vector<1x48x4xbf16>
    %46 = vector.shape_cast %45 : vector<1x48x4xbf16> to vector<48x4xbf16>
    %cst_40 = arith.constant dense<0.000000e+00> : vector<48x128xf32>
    %47 = tpu.matmul %46, %44, %cst_40 {dimension_numbers = #tpu.dot_dimension_numbers<[1], [0], [0], [1], [0, 0, 1, 1], [], []>} : vector<48x4xbf16>, vector<4x128xbf16>, vector<48x128xf32> -> vector<48x128xf32>
    %48 = arith.addf %41, %47 : vector<48x128xf32>
    %c0_41 = arith.constant 0 : index
    %c0_42 = arith.constant 0 : index
    %49 = vector.load %arg4[%c0_41, %c0_42] : memref<48x1xf32, #tpu.memory_space<vmem>>, vector<48x1xf32>
    %50 = vector.broadcast %49 : vector<48x1xf32> to vector<48x128xf32>
    %51 = arith.mulf %48, %50 : vector<48x128xf32>
    %c0_43 = arith.constant 0 : index
    %c0_44 = arith.constant 0 : index
    %52 = vector.load %arg5[%c0_43, %c0_44] : memref<48x1xf32, #tpu.memory_space<vmem>>, vector<48x1xf32>
    %53 = vector.broadcast %52 : vector<48x1xf32> to vector<48x128xf32>
    %54 = arith.addf %51, %53 : vector<48x128xf32>
    %cst_45 = arith.constant 0.000000e+00 : f32
    %55 = vector.broadcast %cst_45 : f32 to vector<48x128xf32>
    %56 = arith.maximumf %54, %55 : vector<48x128xf32>
    %c3_i32 = arith.constant 3 : i32
    %57 = tpu.dynamic_rotate %56 by %c3_i32 dim 1 : vector<48x128xf32>, i32 -> vector<48x128xf32>
    %c-3_i32 = arith.constant -3 : i32
    %58 = vector.broadcast %c-3_i32 : i32 to vector<48x128xi32>
    %59 = arith.addi %0, %58 : vector<48x128xi32>
    %c0_i32 = arith.constant 0 : i32
    %60 = vector.broadcast %c0_i32 : i32 to vector<48x128xi32>
    %61 = arith.cmpi sge, %59, %60 : vector<48x128xi32>
    %c-3_i32_46 = arith.constant -3 : i32
    %62 = vector.broadcast %c-3_i32_46 : i32 to vector<48x128xi32>
    %63 = arith.addi %0, %62 : vector<48x128xi32>
    %c8_i32 = arith.constant 8 : i32
    %64 = vector.broadcast %c8_i32 : i32 to vector<48x128xi32>
    %65 = arith.cmpi slt, %63, %64 : vector<48x128xi32>
    %66 = arith.andi %61, %65 : vector<48x128xi1>
    %cst_47 = arith.constant 0.000000e+00 : f32
    %67 = vector.broadcast %cst_47 : f32 to vector<48x128xf32>
    %68 = arith.select %66, %57, %67 : vector<48x128xi1>, vector<48x128xf32>
    %69 = arith.truncf %68 : vector<48x128xf32> to vector<48x128xbf16>
    %c0_48 = arith.constant 0 : index
    %c0_49 = arith.constant 0 : index
    %c0_50 = arith.constant 0 : index
    %70 = vector.load %arg3[%c0_48, %c0_49, %c0_50] : memref<7x48x48xbf16, #tpu.memory_space<vmem>>, vector<1x48x48xbf16>
    %71 = vector.shape_cast %70 : vector<1x48x48xbf16> to vector<48x48xbf16>
    %cst_51 = arith.constant dense<0.000000e+00> : vector<48x128xf32>
    %72 = tpu.matmul %71, %69, %cst_51 {dimension_numbers = #tpu.dot_dimension_numbers<[1], [0], [0], [1], [0, 0, 1, 1], [], []>} : vector<48x48xbf16>, vector<48x128xbf16>, vector<48x128xf32> -> vector<48x128xf32>
    %c2_i32 = arith.constant 2 : i32
    %73 = tpu.dynamic_rotate %56 by %c2_i32 dim 1 : vector<48x128xf32>, i32 -> vector<48x128xf32>
    %c-2_i32 = arith.constant -2 : i32
    %74 = vector.broadcast %c-2_i32 : i32 to vector<48x128xi32>
    %75 = arith.addi %0, %74 : vector<48x128xi32>
    %c0_i32_52 = arith.constant 0 : i32
    %76 = vector.broadcast %c0_i32_52 : i32 to vector<48x128xi32>
    %77 = arith.cmpi sge, %75, %76 : vector<48x128xi32>
    %c-2_i32_53 = arith.constant -2 : i32
    %78 = vector.broadcast %c-2_i32_53 : i32 to vector<48x128xi32>
    %79 = arith.addi %0, %78 : vector<48x128xi32>
    %c8_i32_54 = arith.constant 8 : i32
    %80 = vector.broadcast %c8_i32_54 : i32 to vector<48x128xi32>
    %81 = arith.cmpi slt, %79, %80 : vector<48x128xi32>
    %82 = arith.andi %77, %81 : vector<48x128xi1>
    %cst_55 = arith.constant 0.000000e+00 : f32
    %83 = vector.broadcast %cst_55 : f32 to vector<48x128xf32>
    %84 = arith.select %82, %73, %83 : vector<48x128xi1>, vector<48x128xf32>
    %85 = arith.truncf %84 : vector<48x128xf32> to vector<48x128xbf16>
    %c1_56 = arith.constant 1 : index
    %c0_57 = arith.constant 0 : index
    %c0_58 = arith.constant 0 : index
    %86 = vector.load %arg3[%c1_56, %c0_57, %c0_58] : memref<7x48x48xbf16, #tpu.memory_space<vmem>>, vector<1x48x48xbf16>
    %87 = vector.shape_cast %86 : vector<1x48x48xbf16> to vector<48x48xbf16>
    %cst_59 = arith.constant dense<0.000000e+00> : vector<48x128xf32>
    %88 = tpu.matmul %87, %85, %cst_59 {dimension_numbers = #tpu.dot_dimension_numbers<[1], [0], [0], [1], [0, 0, 1, 1], [], []>} : vector<48x48xbf16>, vector<48x128xbf16>, vector<48x128xf32> -> vector<48x128xf32>
    %89 = arith.addf %72, %88 : vector<48x128xf32>
    %c1_i32 = arith.constant 1 : i32
    %90 = tpu.dynamic_rotate %56 by %c1_i32 dim 1 : vector<48x128xf32>, i32 -> vector<48x128xf32>
    %c-1_i32 = arith.constant -1 : i32
    %91 = vector.broadcast %c-1_i32 : i32 to vector<48x128xi32>
    %92 = arith.addi %0, %91 : vector<48x128xi32>
    %c0_i32_60 = arith.constant 0 : i32
    %93 = vector.broadcast %c0_i32_60 : i32 to vector<48x128xi32>
    %94 = arith.cmpi sge, %92, %93 : vector<48x128xi32>
    %c-1_i32_61 = arith.constant -1 : i32
    %95 = vector.broadcast %c-1_i32_61 : i32 to vector<48x128xi32>
    %96 = arith.addi %0, %95 : vector<48x128xi32>
    %c8_i32_62 = arith.constant 8 : i32
    %97 = vector.broadcast %c8_i32_62 : i32 to vector<48x128xi32>
    %98 = arith.cmpi slt, %96, %97 : vector<48x128xi32>
    %99 = arith.andi %94, %98 : vector<48x128xi1>
    %cst_63 = arith.constant 0.000000e+00 : f32
    %100 = vector.broadcast %cst_63 : f32 to vector<48x128xf32>
    %101 = arith.select %99, %90, %100 : vector<48x128xi1>, vector<48x128xf32>
    %102 = arith.truncf %101 : vector<48x128xf32> to vector<48x128xbf16>
    %c2_64 = arith.constant 2 : index
    %c0_65 = arith.constant 0 : index
    %c0_66 = arith.constant 0 : index
    %103 = vector.load %arg3[%c2_64, %c0_65, %c0_66] : memref<7x48x48xbf16, #tpu.memory_space<vmem>>, vector<1x48x48xbf16>
    %104 = vector.shape_cast %103 : vector<1x48x48xbf16> to vector<48x48xbf16>
    %cst_67 = arith.constant dense<0.000000e+00> : vector<48x128xf32>
    %105 = tpu.matmul %104, %102, %cst_67 {dimension_numbers = #tpu.dot_dimension_numbers<[1], [0], [0], [1], [0, 0, 1, 1], [], []>} : vector<48x48xbf16>, vector<48x128xbf16>, vector<48x128xf32> -> vector<48x128xf32>
    %106 = arith.addf %89, %105 : vector<48x128xf32>
    %c0_i32_68 = arith.constant 0 : i32
    %107 = vector.broadcast %c0_i32_68 : i32 to vector<48x128xi32>
    %108 = arith.addi %0, %107 : vector<48x128xi32>
    %c0_i32_69 = arith.constant 0 : i32
    %109 = vector.broadcast %c0_i32_69 : i32 to vector<48x128xi32>
    %110 = arith.cmpi sge, %108, %109 : vector<48x128xi32>
    %c0_i32_70 = arith.constant 0 : i32
    %111 = vector.broadcast %c0_i32_70 : i32 to vector<48x128xi32>
    %112 = arith.addi %0, %111 : vector<48x128xi32>
    %c8_i32_71 = arith.constant 8 : i32
    %113 = vector.broadcast %c8_i32_71 : i32 to vector<48x128xi32>
    %114 = arith.cmpi slt, %112, %113 : vector<48x128xi32>
    %115 = arith.andi %110, %114 : vector<48x128xi1>
    %cst_72 = arith.constant 0.000000e+00 : f32
    %116 = vector.broadcast %cst_72 : f32 to vector<48x128xf32>
    %117 = arith.select %115, %56, %116 : vector<48x128xi1>, vector<48x128xf32>
    %118 = arith.truncf %117 : vector<48x128xf32> to vector<48x128xbf16>
    %c3_73 = arith.constant 3 : index
    %c0_74 = arith.constant 0 : index
    %c0_75 = arith.constant 0 : index
    %119 = vector.load %arg3[%c3_73, %c0_74, %c0_75] : memref<7x48x48xbf16, #tpu.memory_space<vmem>>, vector<1x48x48xbf16>
    %120 = vector.shape_cast %119 : vector<1x48x48xbf16> to vector<48x48xbf16>
    %cst_76 = arith.constant dense<0.000000e+00> : vector<48x128xf32>
    %121 = tpu.matmul %120, %118, %cst_76 {dimension_numbers = #tpu.dot_dimension_numbers<[1], [0], [0], [1], [0, 0, 1, 1], [], []>} : vector<48x48xbf16>, vector<48x128xbf16>, vector<48x128xf32> -> vector<48x128xf32>
    %122 = arith.addf %106, %121 : vector<48x128xf32>
    %c127_i32 = arith.constant 127 : i32
    %123 = tpu.dynamic_rotate %56 by %c127_i32 dim 1 : vector<48x128xf32>, i32 -> vector<48x128xf32>
    %c1_i32_77 = arith.constant 1 : i32
    %124 = vector.broadcast %c1_i32_77 : i32 to vector<48x128xi32>
    %125 = arith.addi %0, %124 : vector<48x128xi32>
    %c0_i32_78 = arith.constant 0 : i32
    %126 = vector.broadcast %c0_i32_78 : i32 to vector<48x128xi32>
    %127 = arith.cmpi sge, %125, %126 : vector<48x128xi32>
    %c1_i32_79 = arith.constant 1 : i32
    %128 = vector.broadcast %c1_i32_79 : i32 to vector<48x128xi32>
    %129 = arith.addi %0, %128 : vector<48x128xi32>
    %c8_i32_80 = arith.constant 8 : i32
    %130 = vector.broadcast %c8_i32_80 : i32 to vector<48x128xi32>
    %131 = arith.cmpi slt, %129, %130 : vector<48x128xi32>
    %132 = arith.andi %127, %131 : vector<48x128xi1>
    %cst_81 = arith.constant 0.000000e+00 : f32
    %133 = vector.broadcast %cst_81 : f32 to vector<48x128xf32>
    %134 = arith.select %132, %123, %133 : vector<48x128xi1>, vector<48x128xf32>
    %135 = arith.truncf %134 : vector<48x128xf32> to vector<48x128xbf16>
    %c4_82 = arith.constant 4 : index
    %c0_83 = arith.constant 0 : index
    %c0_84 = arith.constant 0 : index
    %136 = vector.load %arg3[%c4_82, %c0_83, %c0_84] : memref<7x48x48xbf16, #tpu.memory_space<vmem>>, vector<1x48x48xbf16>
    %137 = vector.shape_cast %136 : vector<1x48x48xbf16> to vector<48x48xbf16>
    %cst_85 = arith.constant dense<0.000000e+00> : vector<48x128xf32>
    %138 = tpu.matmul %137, %135, %cst_85 {dimension_numbers = #tpu.dot_dimension_numbers<[1], [0], [0], [1], [0, 0, 1, 1], [], []>} : vector<48x48xbf16>, vector<48x128xbf16>, vector<48x128xf32> -> vector<48x128xf32>
    %139 = arith.addf %122, %138 : vector<48x128xf32>
    %c126_i32 = arith.constant 126 : i32
    %140 = tpu.dynamic_rotate %56 by %c126_i32 dim 1 : vector<48x128xf32>, i32 -> vector<48x128xf32>
    %c2_i32_86 = arith.constant 2 : i32
    %141 = vector.broadcast %c2_i32_86 : i32 to vector<48x128xi32>
    %142 = arith.addi %0, %141 : vector<48x128xi32>
    %c0_i32_87 = arith.constant 0 : i32
    %143 = vector.broadcast %c0_i32_87 : i32 to vector<48x128xi32>
    %144 = arith.cmpi sge, %142, %143 : vector<48x128xi32>
    %c2_i32_88 = arith.constant 2 : i32
    %145 = vector.broadcast %c2_i32_88 : i32 to vector<48x128xi32>
    %146 = arith.addi %0, %145 : vector<48x128xi32>
    %c8_i32_89 = arith.constant 8 : i32
    %147 = vector.broadcast %c8_i32_89 : i32 to vector<48x128xi32>
    %148 = arith.cmpi slt, %146, %147 : vector<48x128xi32>
    %149 = arith.andi %144, %148 : vector<48x128xi1>
    %cst_90 = arith.constant 0.000000e+00 : f32
    %150 = vector.broadcast %cst_90 : f32 to vector<48x128xf32>
    %151 = arith.select %149, %140, %150 : vector<48x128xi1>, vector<48x128xf32>
    %152 = arith.truncf %151 : vector<48x128xf32> to vector<48x128xbf16>
    %c5_91 = arith.constant 5 : index
    %c0_92 = arith.constant 0 : index
    %c0_93 = arith.constant 0 : index
    %153 = vector.load %arg3[%c5_91, %c0_92, %c0_93] : memref<7x48x48xbf16, #tpu.memory_space<vmem>>, vector<1x48x48xbf16>
    %154 = vector.shape_cast %153 : vector<1x48x48xbf16> to vector<48x48xbf16>
    %cst_94 = arith.constant dense<0.000000e+00> : vector<48x128xf32>
    %155 = tpu.matmul %154, %152, %cst_94 {dimension_numbers = #tpu.dot_dimension_numbers<[1], [0], [0], [1], [0, 0, 1, 1], [], []>} : vector<48x48xbf16>, vector<48x128xbf16>, vector<48x128xf32> -> vector<48x128xf32>
    %156 = arith.addf %139, %155 : vector<48x128xf32>
    %c125_i32 = arith.constant 125 : i32
    %157 = tpu.dynamic_rotate %56 by %c125_i32 dim 1 : vector<48x128xf32>, i32 -> vector<48x128xf32>
    %c3_i32_95 = arith.constant 3 : i32
    %158 = vector.broadcast %c3_i32_95 : i32 to vector<48x128xi32>
    %159 = arith.addi %0, %158 : vector<48x128xi32>
    %c0_i32_96 = arith.constant 0 : i32
    %160 = vector.broadcast %c0_i32_96 : i32 to vector<48x128xi32>
    %161 = arith.cmpi sge, %159, %160 : vector<48x128xi32>
    %c3_i32_97 = arith.constant 3 : i32
    %162 = vector.broadcast %c3_i32_97 : i32 to vector<48x128xi32>
    %163 = arith.addi %0, %162 : vector<48x128xi32>
    %c8_i32_98 = arith.constant 8 : i32
    %164 = vector.broadcast %c8_i32_98 : i32 to vector<48x128xi32>
    %165 = arith.cmpi slt, %163, %164 : vector<48x128xi32>
    %166 = arith.andi %161, %165 : vector<48x128xi1>
    %cst_99 = arith.constant 0.000000e+00 : f32
    %167 = vector.broadcast %cst_99 : f32 to vector<48x128xf32>
    %168 = arith.select %166, %157, %167 : vector<48x128xi1>, vector<48x128xf32>
    %169 = arith.truncf %168 : vector<48x128xf32> to vector<48x128xbf16>
    %c6_100 = arith.constant 6 : index
    %c0_101 = arith.constant 0 : index
    %c0_102 = arith.constant 0 : index
    %170 = vector.load %arg3[%c6_100, %c0_101, %c0_102] : memref<7x48x48xbf16, #tpu.memory_space<vmem>>, vector<1x48x48xbf16>
    %171 = vector.shape_cast %170 : vector<1x48x48xbf16> to vector<48x48xbf16>
    %cst_103 = arith.constant dense<0.000000e+00> : vector<48x128xf32>
    %172 = tpu.matmul %171, %169, %cst_103 {dimension_numbers = #tpu.dot_dimension_numbers<[1], [0], [0], [1], [0, 0, 1, 1], [], []>} : vector<48x48xbf16>, vector<48x128xbf16>, vector<48x128xf32> -> vector<48x128xf32>
    %173 = arith.addf %156, %172 : vector<48x128xf32>
    %c0_104 = arith.constant 0 : index
    %c0_105 = arith.constant 0 : index
    %174 = vector.load %arg6[%c0_104, %c0_105] : memref<48x1xf32, #tpu.memory_space<vmem>>, vector<48x1xf32>
    %175 = vector.broadcast %174 : vector<48x1xf32> to vector<48x128xf32>
    %176 = arith.mulf %173, %175 : vector<48x128xf32>
    %c0_106 = arith.constant 0 : index
    %c0_107 = arith.constant 0 : index
    %177 = vector.load %arg7[%c0_106, %c0_107] : memref<48x1xf32, #tpu.memory_space<vmem>>, vector<48x1xf32>
    %178 = vector.broadcast %177 : vector<48x1xf32> to vector<48x128xf32>
    %179 = arith.addf %176, %178 : vector<48x128xf32>
    %c8_i32_108 = arith.constant 8 : i32
    %180 = vector.broadcast %c8_i32_108 : i32 to vector<48x128xi32>
    %181 = arith.cmpi slt, %0, %180 : vector<48x128xi32>
    %cst_109 = arith.constant 0.000000e+00 : f32
    %182 = vector.broadcast %cst_109 : f32 to vector<48x128xf32>
    %183 = arith.select %181, %179, %182 : vector<48x128xi1>, vector<48x128xf32>
    %cst_110 = arith.constant dense<0.000000e+00> : vector<48xf32>
    %184 = vector.multi_reduction <add>, %183, %cst_110 [1] : vector<48x128xf32> to vector<48xf32>
    %185 = vector.shape_cast %184 : vector<48xf32> to vector<48x1xf32>
    %cst_111 = arith.constant 1.250000e-01 : f32
    %186 = vector.broadcast %cst_111 : f32 to vector<48x1xf32>
    %187 = arith.mulf %185, %186 : vector<48x1xf32>
    %c0_112 = arith.constant 0 : index
    %c0_113 = arith.constant 0 : index
    %188 = vector.load %arg8[%c0_112, %c0_113] : memref<48x3xf32, #tpu.memory_space<vmem>>, vector<48x3xf32>
    %189 = vector.broadcast %187 : vector<48x1xf32> to vector<48x3xf32>
    %190 = arith.mulf %188, %189 : vector<48x3xf32>
    %cst_114 = arith.constant dense<0.000000e+00> : vector<3xf32>
    %191 = vector.multi_reduction <add>, %190, %cst_114 [0] : vector<48x3xf32> to vector<3xf32>
    %192 = vector.shape_cast %191 : vector<3xf32> to vector<1x3xf32>
    %cst_115 = arith.constant 0.000000e+00 : f32
    %193 = vector.broadcast %cst_115 : f32 to vector<1x3xf32>
    %194 = arith.maximumf %192, %193 : vector<1x3xf32>
    %c0_116 = arith.constant 0 : index
    %c0_117 = arith.constant 0 : index
    %195 = vector.load %arg9[%c0_116, %c0_117] : memref<48x3xf32, #tpu.memory_space<vmem>>, vector<48x3xf32>
    %196 = vector.broadcast %194 : vector<1x3xf32> to vector<48x3xf32>
    %197 = arith.mulf %195, %196 : vector<48x3xf32>
    %cst_118 = arith.constant dense<0.000000e+00> : vector<48xf32>
    %198 = vector.multi_reduction <add>, %197, %cst_118 [1] : vector<48x3xf32> to vector<48xf32>
    %199 = vector.shape_cast %198 : vector<48xf32> to vector<48x1xf32>
    %200 = arith.negf %199 : vector<48x1xf32>
    %201 = math.exp %200 : vector<48x1xf32>
    %cst_119 = arith.constant 1.000000e+00 : f32
    %202 = vector.broadcast %cst_119 : f32 to vector<48x1xf32>
    %203 = arith.addf %202, %201 : vector<48x1xf32>
    %204 = arith.divf %202, %203 : vector<48x1xf32>
    %205 = vector.broadcast %204 : vector<48x1xf32> to vector<48x128xf32>
    %206 = arith.mulf %179, %205 : vector<48x128xf32>
    %c1_120 = arith.constant 1 : index
    %c0_121 = arith.constant 0 : index
    %c1_122 = arith.constant 1 : index
    %207 = vector.load %arg1[%c1_120, %c0_121, %c1_122] : memref<2x4x131xf32, #tpu.memory_space<vmem>>, vector<1x4x128xf32>
    %208 = vector.shape_cast %207 : vector<1x4x128xf32> to vector<4x128xf32>
    %c0_123 = arith.constant 0 : index
    %c0_124 = arith.constant 0 : index
    %c2_125 = arith.constant 2 : index
    %209 = vector.load %arg1[%c0_123, %c0_124, %c2_125] : memref<2x4x131xf32, #tpu.memory_space<vmem>>, vector<1x4x128xf32>
    %210 = vector.shape_cast %209 : vector<1x4x128xf32> to vector<4x128xf32>
    %211 = arith.maximumf %208, %210 : vector<4x128xf32>
    %c0_126 = arith.constant 0 : index
    %c0_127 = arith.constant 0 : index
    %212 = vector.load %arg10[%c0_126, %c0_127] : memref<48x4xf32, #tpu.memory_space<vmem>>, vector<48x4xf32>
    %cst_128 = arith.constant dense<0.000000e+00> : vector<48x128xf32>
    %213 = tpu.matmul %212, %211, %cst_128 {dimension_numbers = #tpu.dot_dimension_numbers<[1], [0], [0], [1], [0, 0, 1, 1], [], []>} : vector<48x4xf32>, vector<4x128xf32>, vector<48x128xf32> -> vector<48x128xf32>
    %c0_129 = arith.constant 0 : index
    %c0_130 = arith.constant 0 : index
    %214 = vector.load %arg11[%c0_129, %c0_130] : memref<48x1xf32, #tpu.memory_space<vmem>>, vector<48x1xf32>
    %215 = vector.broadcast %214 : vector<48x1xf32> to vector<48x128xf32>
    %216 = arith.addf %213, %215 : vector<48x128xf32>
    %217 = arith.addf %206, %216 : vector<48x128xf32>
    %cst_131 = arith.constant 0.000000e+00 : f32
    %218 = vector.broadcast %cst_131 : f32 to vector<48x128xf32>
    %219 = arith.maximumf %217, %218 : vector<48x128xf32>
    %c0_132 = arith.constant 0 : index
    %c0_133 = arith.constant 0 : index
    %c0_134 = arith.constant 0 : index
    %220 = vector.load %arg12[%c0_132, %c0_133, %c0_134] : memref<1x48x128xf32, #tpu.memory_space<vmem>>, vector<1x48x128xf32>
    %221 = vector.shape_cast %220 : vector<1x48x128xf32> to vector<48x128xf32>
    %222 = vector.shape_cast %219 : vector<48x128xf32> to vector<1x48x128xf32>
    tpu.vector_store %arg12[%c0_132, %c0_133, %c0_134], %222 {strides = array<i32>} : memref<1x48x128xf32, #tpu.memory_space<vmem>>, vector<1x48x128xf32>,
    return
  }
  func.func @transform_0(%arg0: i32) -> (i32, i32, i32) {
    %c0_i32 = arith.constant 0 : i32
    %c0_i32_0 = arith.constant 0 : i32
    %c0_i32_1 = arith.constant 0 : i32
    return %arg0, %c0_i32, %c0_i32_0 : i32, i32, i32
  }
  func.func @transform_1(%arg0: i32) -> (i32, i32, i32) {
    %c0_i32 = arith.constant 0 : i32
    %c0_i32_0 = arith.constant 0 : i32
    %c0_i32_1 = arith.constant 0 : i32
    %c0_i32_2 = arith.constant 0 : i32
    return %c0_i32, %c0_i32_0, %c0_i32_1 : i32, i32, i32
  }
  func.func @transform_2(%arg0: i32) -> (i32, i32, i32) {
    %c0_i32 = arith.constant 0 : i32
    %c0_i32_0 = arith.constant 0 : i32
    %c0_i32_1 = arith.constant 0 : i32
    %c0_i32_2 = arith.constant 0 : i32
    return %c0_i32, %c0_i32_0, %c0_i32_1 : i32, i32, i32
  }
  func.func @transform_3(%arg0: i32) -> (i32, i32) {
    %c0_i32 = arith.constant 0 : i32
    %c0_i32_0 = arith.constant 0 : i32
    %c0_i32_1 = arith.constant 0 : i32
    return %c0_i32, %c0_i32_0 : i32, i32
  }
  func.func @transform_4(%arg0: i32) -> (i32, i32) {
    %c0_i32 = arith.constant 0 : i32
    %c0_i32_0 = arith.constant 0 : i32
    %c0_i32_1 = arith.constant 0 : i32
    return %c0_i32, %c0_i32_0 : i32, i32
  }
  func.func @transform_5(%arg0: i32) -> (i32, i32) {
    %c0_i32 = arith.constant 0 : i32
    %c0_i32_0 = arith.constant 0 : i32
    %c0_i32_1 = arith.constant 0 : i32
    return %c0_i32, %c0_i32_0 : i32, i32
  }
  func.func @transform_6(%arg0: i32) -> (i32, i32) {
    %c0_i32 = arith.constant 0 : i32
    %c0_i32_0 = arith.constant 0 : i32
    %c0_i32_1 = arith.constant 0 : i32
    return %c0_i32, %c0_i32_0 : i32, i32
  }
  func.func @transform_7(%arg0: i32) -> (i32, i32) {
    %c0_i32 = arith.constant 0 : i32
    %c0_i32_0 = arith.constant 0 : i32
    %c0_i32_1 = arith.constant 0 : i32
    return %c0_i32, %c0_i32_0 : i32, i32
  }
  func.func @transform_8(%arg0: i32) -> (i32, i32) {
    %c0_i32 = arith.constant 0 : i32
    %c0_i32_0 = arith.constant 0 : i32
    %c0_i32_1 = arith.constant 0 : i32
    return %c0_i32, %c0_i32_0 : i32, i32
  }
  func.func @transform_9(%arg0: i32) -> (i32, i32) {
    %c0_i32 = arith.constant 0 : i32
    %c0_i32_0 = arith.constant 0 : i32
    %c0_i32_1 = arith.constant 0 : i32
    return %c0_i32, %c0_i32_0 : i32, i32
  }
  func.func @transform_10(%arg0: i32) -> (i32, i32) {
    %c0_i32 = arith.constant 0 : i32
    %c0_i32_0 = arith.constant 0 : i32
    %c0_i32_1 = arith.constant 0 : i32
    return %c0_i32, %c0_i32_0 : i32, i32
  }
  func.func @transform_11(%arg0: i32) -> (i32, i32, i32) {
    %c0_i32 = arith.constant 0 : i32
    %c0_i32_0 = arith.constant 0 : i32
    %c0_i32_1 = arith.constant 0 : i32
    return %arg0, %c0_i32, %c0_i32_0 : i32, i32, i32
  }
}

</mosaic_0001>

<bundles_post_ra>
// kernel: basic_block_forward.1
= control target key start
LH: loop header
LB: loop body
LE: loop exit
PB: predicated region body
PF: predicated region fallthrough
CT: control target
= control target key end

     0   :  { %s2687_s17 = smov 0   ;;  %s3328_s0 = inlined_call_operand.vmem [shape: f32[4,4,131], index: 0, kind: input, shape index: {}]   ;;  %s3329_s1 = inlined_call_operand.vmem [shape: bf16[7,48,4], index: 1, kind: input, shape index: {}]   ;;  %s3330_s2 = inlined_call_operand.vmem [shape: bf16[7,48,48], index: 2, kind: input, shape index: {}]   ;;  %s3331_s3 = inlined_call_operand.vmem [shape: f32[48,1], index: 3, kind: input, shape index: {}]   ;;  %s3332_s4 = inlined_call_operand.vmem [shape: f32[48,1], index: 4, kind: input, shape index: {}]   ;;  %s3333_s5 = inlined_call_operand.vmem [shape: f32[48,1], index: 5, kind: input, shape index: {}]   ;;  %s3334_s6 = inlined_call_operand.vmem [shape: f32[48,1], index: 6, kind: input, shape index: {}]   ;;  %s3335_s7 = inlined_call_operand.vmem [shape: f32[48,3], index: 7, kind: input, shape index: {}]   ;;  %s3336_s8 = inlined_call_operand.vmem [shape: f32[48,3], index: 8, kind: input, shape index: {}]   ;;  %s3337_s9 = inlined_call_operand.vmem [shape: f32[48,4], index: 9, kind: input, shape index: {}]   ;;  %s3338_s10 = inlined_call_operand.vmem [shape: f32[48,1], index: 10, kind: input, shape index: {}]   ;;  %s3339_s11 = inlined_call_operand.vmem [shape: f32[2,48,128], index: 11, kind: output, shape index: {}]  }
   0x1 LB: > { %s2693_s18 = sadd.s32 4294967295, %s2618_s17   ;;  %p2067_p0 = scmp.ge.s32.totalorder %s2618_s17, 1  ;;  %s2618_s17 = sphi %s2687_s17, %s21_s17  }
   0x2   : > { %p339_p1 = scmp.lt.s32.totalorder %s2618_s17, 3 }
   0x4   : > { %p340_p2 = pnand %p2067_p0, %p339_p1 }
   0x5   : > { %s2068_s19 = sshll.u32 (!%p340_p2), %s2693_s18, 1  ;;  %s2620_s24 = smov (!%p340_p2), 127  }
   0x6   : > { %343 = sbr.rel (%p340_p2) target bundleno = 1045 (0x415), region = 64  ;;  %p381_p3 = scmp.lt.s32.totalorder (!%p340_p2), %s2068_s19, 3 }
   0x7   : > { %s2621_s25 = smov (!%p340_p2), 126   ;;  %s2622_s30 = smov (!%p340_p2), 125  }
   0x8   : > { %s2625_s21 = smov (!%p340_p2), 3   ;;  %s2626_s22 = smov (!%p340_p2), 1  }
   0x9   : > { %p387_p4 = scmp.lt.s32.totalorder (!%p340_p2), %s2693_s18, 1 }
   0xb   : > { %s3361_s19 = smov (!%p381_p3, %s2068_s19), 3  ;;  %vm438_vm0 = vcmask 1041408   ;;  %v2436_v18 = vld [vmem:[%s3329_s1] sm:$0xff]  ;;  %vm428_vm1 = vcmask 31744   ;;  %v2437_v30 = vld [vmem:[%s3329_s1 + $0x8] sm:$0xff]  ;;  %v2439_v32 = vld [vmem:[%s3329_s1 + $0x18] sm:$0xff] }
   0xc   : > { %s2435_s20 = sshll.u32 %s3361_s19, 3  ;;  %v2440_v21 = vld [vmem:[%s3329_s1 + $0x20] sm:$0xff]  ;;  %v2441_v31 = vld [vmem:[%s3329_s1 + $0x28] sm:$0xff]  ;;  %v2438_v33 = vld [vmem:[%s3329_s1 + $0x10] sm:$0xff]  ;;  %vm554_vm2 = vcmask 1039360   ;;  %vm876_vm3 = vcmask 1022976  }
   0xd   : > { %s385_s23 = scalar_lea.vmem %s3328_s0, %s2435_s20  ;;  %v2442_v40 = vld [vmem:[%s3329_s1 + $0x30] sm:$0xff]  ;;  %v2445_v46 = vld [vmem:[%s3329_s1 + $0x48] sm:$0xff]  ;;  %vm715_vm4 = vcmask 1031168   ;;  %v924_v49 = vld [vmem:[%s3331_s3 + $0x20] sm:$0xff]  ;;  %v2623_v50 = vmov 0   ;;  %s2624_s20 = smov 2  }
   0xe   : > { %v2701_v0 = vld [vmem:[%s385_s23] sm:$0xff]  ;;  %v2704_v1 = vld [vmem:[%s385_s23 + $0x8] sm:$0xff]  ;;  %2495 = vset.pattern.permute.xlu1 %v2623_v50  ;;  %2497 = vset.pattern.permute.xlu0 %v2623_v50  ;;  %v2443_v57 = vld [vmem:[%s3329_s1 + $0x38] sm:$0xff]  ;;  %vm1088_vm11 = vcmask 392192   ;;  %s3363_s18 = smov (!%p387_p4, %s2693_s18), 1 }
   0xf   : > { %519 = vst [vmem:[#allocation1] ss:$2 sm:$0xff] %v2701_v0  ;;  %v395_v13 = vld [vmem:[%s385_s23] sm:$0xf]  ;;  %v2072_v15 = vld [vmem:[%s385_s23 + $0x8] sm:$0xf]  ;;  %2496 = vset.pattern.permute.xlu2 %v2623_v50 }
  0x10   : > { %v396_v14 = vpack.c.bf16 %v395_v13, %v395_v13  ;;  %v405_v16 = vpack.c.bf16 %v2072_v15, %v2072_v15  ;;  %v2448_v58 = vld [vmem:[%s3329_s1 + $0x60] sm:$0xff]  ;;  %v2451_v60 = vld [vmem:[%s3329_s1 + $0x78] sm:$0xff]  ;;  %v967_v61 = vld [vmem:[%s3332_s4 + $0x28] sm:$0xff] }
  0x11   : > { %v966_v62 = vld [vmem:[%s3332_s4 + $0x20] sm:$0xff]  ;;  %v2446_v63 = vld [vmem:[%s3329_s1 + $0x50] sm:$0xff] }
  0x12   : > { %v491_v17 = vsel %vm438_vm0, %v396_v14, 0  ;;  %v440_v20 = vsel %vm438_vm0, %v405_v16, 0  ;;  %v2454_v13 = vld [vmem:[%s3329_s1 + $0x90] sm:$0xff]  ;;  %v2453_v14 = vld [vmem:[%s3329_s1 + $0x88] sm:$0xff] }
  0x13   : > { %500 = vmatpush.bf16.msra.mxu1 %v491_v17  ;;  %2478 = vmatpush.bf16.msra.mxu3 %v440_v20  ;;  %v922_v15 = vld [vmem:[%s3331_s3 + $0x10] sm:$0xff]  ;;  %v2455_v17 = vld [vmem:[%s3329_s1 + $0x98] sm:$0xff] }
  0x14   : > { %449 = vmatpush.bf16.msra.mxu0 %v440_v20  ;;  %v964_v16 = vld [vmem:[%s3332_s4 + $0x10] sm:$0xff] }
  0x16   : > { %v520_v2 = vld.sshfl [vmem:[#allocation1] sm:$0xff pattern:$0x75316420]  ;;  %v521_v3 = vld.sshfl [vmem:[#allocation1 + $0x8] sm:$0xff pattern:$0x75316420]  ;;  %2106 = vmatmul.msk.bf16.vlgmr.msra.gmra.mxu1 %vm428_vm1, %v2436_v18  ;;  %2092 = vmatmul.msk.bf16.vlgmr.msra.gmra.mxu3 %vm428_vm1, %v2440_v21 }
  0x17   : > { %v524_v4 = vpack.c.bf16 %v520_v2, %v520_v2  ;;  %600 = vst [vmem:[#allocation1] ss:$2 sm:$0xff] %v2704_v1  ;;  %v525_v5 = vpack.c.bf16 %v521_v3, %v521_v3  ;;  %2091 = vmatmul.msk.bf16.vlgmr.msra.gmra.mxu0 %vm428_vm1, %v2439_v32  ;;  %v923_v2 = vld [vmem:[%s3331_s3 + $0x18] sm:$0xff]  ;;  %v921_v18 = vld [vmem:[%s3331_s3 + $0x8] sm:$0xff] }
  0x18   : > { %v965_v3 = vld [vmem:[%s3332_s4 + $0x18] sm:$0xff] }
  0x19   : > { %550 = vrot.lane.b32.xlu0 %v524_v4, %s2620_s24  ;;  %v2444_v4 = vld [vmem:[%s3329_s1 + $0x40] sm:$0xff] }
  0x1e   : > { %v601_v6 = vld.sshfl [vmem:[#allocation1] sm:$0xff pattern:$0x75316420]  ;;  %v602_v7 = vld.sshfl [vmem:[#allocation1 + $0x8] sm:$0xff pattern:$0x75316420] }
  0x1f   : > { %v605_v8 = vpack.c.bf16 %v601_v6, %v601_v6  ;;  %680 = vst [vmem:[#allocation1] ss:$2 sm:$0xff] %v2701_v0  ;;  %v606_v9 = vpack.c.bf16 %v602_v7, %v602_v7  ;;  %v2452_v6 = vld [vmem:[%s3329_s1 + $0x80] sm:$0xff] }
  0x20   : > { %v920_v7 = vld [vmem:[%s3331_s3] sm:$0xff] }
  0x21   : > { %631 = vrot.lane.b32.xlu1 %v605_v8, %s2620_s24  ;;  %552 = vrot.lane.b32.xlu0 %v525_v5, %s2620_s24  ;;  %v2449_v5 = vld [vmem:[%s3329_s1 + $0x68] sm:$0xff]  ;;  %v962_v8 = vld [vmem:[%s3332_s4] sm:$0xff] }
  0x26   : > { %v681_v10 = vld.sshfl [vmem:[#allocation1] sm:$0xff pattern:$0x75316420]  ;;  %v682_v11 = vld.sshfl [vmem:[#allocation1 + $0x8] sm:$0xff pattern:$0x75316420]  ;;  %2107 = vmatmul.msk.bf16.gmra.mxu1 %vm428_vm1, %v2437_v30  ;;  %2093 = vmatmul.msk.bf16.gmra.mxu3 %vm428_vm1, %v2441_v31 }
  0x27   : > { %v685_v12 = vpack.c.bf16 %v681_v10, %v681_v10  ;;  %761 = vst [vmem:[#allocation1] ss:$2 sm:$0xff] %v2704_v1  ;;  %v686_v19 = vpack.c.bf16 %v682_v11, %v682_v11  ;;  %v2447_v10 = vld [vmem:[%s3329_s1 + $0x58] sm:$0xff]  ;;  %v963_v11 = vld [vmem:[%s3332_s4 + $0x8] sm:$0xff] }
  0x29   : > { %633 = vrot.lane.b32.xlu1 %v606_v9, %s2620_s24  ;;  %711 = vrot.lane.b32.xlu0 %v685_v12, %s2621_s25  ;;  %v925_v9 = vld [vmem:[%s3331_s3 + $0x28] sm:$0xff]  ;;  %v2450_v12 = vld [vmem:[%s3329_s1 + $0x70] sm:$0xff] }
  0x2e   : > { %v762_v22 = vld.sshfl [vmem:[#allocation1] sm:$0xff pattern:$0x75316420]  ;;  %v763_v23 = vld.sshfl [vmem:[#allocation1 + $0x8] sm:$0xff pattern:$0x75316420] }
  0x2f   : > { %v767_v24 = vpack.c.bf16 %v763_v23, %v763_v23  ;;  %841 = vst [vmem:[#allocation1] ss:$2 sm:$0xff] %v2701_v0  ;;  %v766_v29 = vpack.c.bf16 %v762_v22, %v762_v22 }
  0x31   : > { %713 = vrot.lane.b32.xlu1 %v686_v19, %s2621_s25  ;;  %794 = vrot.lane.b32.xlu0 %v767_v24, %s2621_s25  ;;  %v2456_v19 = vld [vmem:[%s3329_s1 + $0xa0] sm:$0xff] }
  0x36   : > { %v842_v25 = vld.sshfl [vmem:[#allocation1] sm:$0xff pattern:$0x75316420]  ;;  %v843_v27 = vld.sshfl [vmem:[#allocation1 + $0x8] sm:$0xff pattern:$0x75316420]  ;;  %2108 = vmatmul.msk.bf16.gmra.mxu1 %vm428_vm1, %v2438_v33 }
  0x37   : > { %v846_v26 = vpack.c.bf16 %v842_v25, %v842_v25  ;;  %v847_v28 = vpack.c.bf16 %v843_v27, %v843_v27 }
  0x39   : > { %872 = vrot.lane.b32.xlu2 %v846_v26, %s2622_s30  ;;  %948 = vperm.xlu1 %2495, %v924_v49  }
  0x3a   : > { %990 = vperm.xlu0 %2497, %v966_v62  }
  0x41   : > { %874 = vrot.lane.b32.xlu2 %v847_v28, %s2622_s30  ;;  %995 = vperm.xlu1 %2495, %v967_v61  }
  0x42   : > { %985 = vperm.xlu0 %2497, %v965_v3  }
  0x49   : > { %792 = vrot.lane.b32.xlu2 %v766_v29, %s2621_s25  ;;  %943 = vperm.xlu1 %2495, %v923_v2  }
  0x4a   : > { %970 = vperm.xlu0 %2497, %v962_v8  }
  0x51   : > { %953 = vperm.xlu2 %2496, %v925_v9   ;;  %928 = vperm.xlu1 %2495, %v920_v7  }
  0x59   : > { %975 = vperm.xlu1 %2495, %v963_v11   ;;  %938 = vperm.xlu2 %2496, %v922_v15  }
  0x61   : > { %980 = vperm.xlu2 %2496, %v964_v16  }
  0x69   : > { %933 = vperm.xlu2 %2496, %v921_v18  }
  0x8b   : > { %v551_v34 = vpop.permute.xlu0 %550 }
  0x93   : > { %v632_v35 = vpop.permute.xlu1 %631  ;;  %v553_v36 = vpop.permute.xlu0 %552 }
  0x94   : > { %v873_v37 = vpop.permute.xlu2 %872  ;;  %v555_v38 = vsel %vm554_vm2, %v551_v34, %v553_v36  ;;  %v502_v20 = vpop.f32.mrf.mxu1 }
  0x95   : > { %v566_v39 = vsel %vm438_vm0, %v555_v38, 0  ;;  %v451_v24 = vpop.f32.mrf.mxu0 }
  0x96   : > { %575 = vmatpush.bf16.msra.mxu2 %v566_v39  ;;  %v503_v26 = vadd.f32 %v502_v20, %v451_v24 }
  0x99   : > { %2127 = vmatmul.msk.bf16.vlgmr.msra.gmra.mxu2 %vm428_vm1, %v2442_v40  ;;  %v456_v22 = vpop.f32.mrf.mxu3 }
  0x9b   : > { %v634_v41 = vpop.permute.xlu1 %633  ;;  %v712_v42 = vpop.permute.xlu0 %711 }
  0x9c   : > { %v875_v43 = vpop.permute.xlu2 %874  ;;  %v635_v44 = vsel %vm554_vm2, %v632_v35, %v634_v41  ;;  %v504_v21 = vpop.f32.mrf.mxu1 }
  0x9d   : > { %v646_v45 = vsel %vm438_vm0, %v635_v44, 0  ;;  %v877_v47 = vsel %vm876_vm3, %v873_v37, %v875_v43  ;;  %v453_v30 = vpop.f32.mrf.mxu0 }
  0x9e   : > { %655 = vmatpush.bf16.msrb.mxu3 %v646_v45  ;;  %v888_v48 = vsel %vm438_vm0, %v877_v47, 0  ;;  %v505_v32 = vadd.f32 %v504_v21, %v453_v30 }
  0x9f   : > { %897 = vmatpush.bf16.msrb.mxu2 %v888_v48 }
  0xa1   : > { %2149 = vmatmul.msk.bf16.vlgmr.msrb.gmra.mxu3 %vm428_vm1, %v2445_v46  ;;  %v458_v25 = vpop.f32.mrf.mxu3 }
  0xa3   : > { %v714_v51 = vpop.permute.xlu1 %713  ;;  %v795_v52 = vpop.permute.xlu0 %794 }
  0xa4   : > { %v793_v53 = vpop.permute.xlu2 %792  ;;  %v716_v54 = vsel %vm715_vm4, %v712_v42, %v714_v51  ;;  %v507_v23 = vpop.f32.mrf.mxu1 }
  0xa5   : > { %v727_v55 = vsel %vm438_vm0, %v716_v54, 0  ;;  %v796_v56 = vsel %vm715_vm4, %v793_v53, %v795_v52 }
  0xa6   : > { %736 = vmatpush.bf16.msrb.mxu0 %v727_v55  ;;  %v807_v59 = vsel %vm438_vm0, %v796_v56, 0 }
  0xa7   : > { %816 = vmatpush.bf16.msrb.mxu1 %v807_v59 }
  0xa9   : > { %2128 = vmatmul.msk.bf16.gmra.mxu2 %vm428_vm1, %v2443_v57  ;;  %2170 = vmatmul.msk.bf16.vlgmr.msrb.gmra.mxu0 %vm428_vm1, %v2448_v58  ;;  %v2849_v31 = vpop.f32.mrf.mxu3 }
  0xaa   : > { %2192 = vmatmul.msk.bf16.vlgmr.msrb.gmra.mxu1 %vm428_vm1, %v2451_v60 }
  0xab   : > { %v2853_v38 = vpop.permute.xlu1 %948 }
  0xac   : > { %v509_v29 = vpop.f32.mrf.mxu1  ;;  %v2857_v41 = vpop.permute.xlu2 %953 }
  0xad   : > { %v2861_v47 = vpop.permute.xlu0 %990  ;;  %v510_v16 = vadd.f32 %v509_v29, %v458_v25 }
  0xb1   : > { %2150 = vmatmul.msk.bf16.gmra.mxu3 %vm428_vm1, %v2446_v63  ;;  %v2851_v36 = vpop.f32.mrf.mxu3 }
  0xb3   : > { %v2859_v43 = vpop.permute.xlu1 %995 }
  0xb4   : > { %v512_v35 = vpop.f32.mrf.mxu1  ;;  %v939_v48 = vpop.permute.xlu2 %938 }
  0xb5   : > { %v986_v56 = vpop.permute.xlu0 %985  ;;  %v513_v25 = vadd.f32 %v512_v35, %v2849_v31 }
  0xb9   : > { %2129 = vmatmul.msk.bf16.gmra.mxu2 %vm428_vm1, %v2444_v4  ;;  %2171 = vmatmul.msk.bf16.gmra.mxu0 %vm428_vm1, %v2449_v5  ;;  %v508_v4 = vadd.f32 %v507_v23, %v456_v22 }
  0xba   : > { %2193 = vmatmul.msk.bf16.gmra.mxu1 %vm428_vm1, %v2452_v6 }
  0xbb   : > { %v944_v50 = vpop.permute.xlu1 %943 }
  0xbc   : > { %v2855_v39 = vpop.f32.mrf.mxu1  ;;  %v981_v57 = vpop.permute.xlu2 %980 }
  0xbd   : > { %v971_v9 = vpop.permute.xlu0 %970 }
  0xc1   : > { %2151 = vmatmul.msk.bf16.gmra.mxu3 %vm428_vm1, %v2447_v10 }
  0xc3   : > { %v929_v63 = vpop.permute.xlu1 %928 }
  0xc4   : > { %v934_v10 = vpop.permute.xlu2 %933 }
  0xc9   : > { %2172 = vmatmul.msk.bf16.gmra.mxu0 %vm428_vm1, %v2450_v12  ;;  %2213 = vmatmul.msk.bf16.vlgmr.msrb.gmra.mxu2 %vm428_vm1, %v2454_v13 }
  0xca   : > { %2194 = vmatmul.msk.bf16.gmra.mxu1 %vm428_vm1, %v2453_v14 }
  0xcb   : > { %v976_v15 = vpop.permute.xlu1 %975 }
  0xd9   : > { %2214 = vmatmul.msk.bf16.gmra.mxu2 %vm428_vm1, %v2455_v17 }
  0xe9   : > { %2215 = vmatmul.msk.bf16.gmra.mxu2 %vm428_vm1, %v2456_v19 }
 0x11c   : > { %v577_v27 = vpop.f32.mrf.mxu2 }
 0x11d   : > { %v592_v28 = vadd.f32 %v577_v27, %v503_v26 }
 0x124   : > { %v579_v33 = vpop.f32.mrf.mxu2  ;;  %v657_v42 = vpop.f32.mrf.mxu3 }
 0x125   : > { %v593_v34 = vadd.f32 %v579_v33, %v505_v32  ;;  %v672_v53 = vadd.f32 %v657_v42, %v592_v28 }
 0x126   : > { %v738_v44 = vpop.f32.mrf.mxu0 }
 0x127   : > { %v818_v46 = vpop.f32.mrf.mxu1  ;;  %v753_v55 = vadd.f32 %v738_v44, %v672_v53 }
 0x129   : > { %v833_v61 = vadd.f32 %v818_v46, %v753_v55  ;;  %v515_v55 = vadd.f32 %v2855_v39, %v2851_v36 }
 0x12c   : > { %v582_v37 = vpop.f32.mrf.mxu2  ;;  %v659_v49 = vpop.f32.mrf.mxu3 }
 0x12d   : > { %v673_v59 = vadd.f32 %v659_v49, %v593_v34  ;;  %v594_v6 = vadd.f32 %v582_v37, %v508_v4 }
 0x12e   : > { %v740_v51 = vpop.f32.mrf.mxu0 }
 0x12f   : > { %v820_v54 = vpop.f32.mrf.mxu1  ;;  %v754_v2 = vadd.f32 %v740_v51, %v673_v59 }
 0x131   : > { %v834_v7 = vadd.f32 %v820_v54, %v754_v2 }
 0x134   : > { %v584_v40 = vpop.f32.mrf.mxu2  ;;  %v662_v58 = vpop.f32.mrf.mxu3 }
 0x135   : > { %v674_v13 = vadd.f32 %v662_v58, %v594_v6  ;;  %v595_v20 = vadd.f32 %v584_v40, %v510_v16 }
 0x136   : > { %v743_v62 = vpop.f32.mrf.mxu0 }
 0x137   : > { %v823_v5 = vpop.f32.mrf.mxu1  ;;  %v755_v21 = vadd.f32 %v743_v62, %v674_v13 }
 0x139   : > { %v835_v30 = vadd.f32 %v823_v5, %v755_v21 }
 0x13c   : > { %v587_v45 = vpop.f32.mrf.mxu2  ;;  %v664_v11 = vpop.f32.mrf.mxu3 }
 0x13d   : > { %v675_v26 = vadd.f32 %v664_v11, %v595_v20  ;;  %v596_v44 = vadd.f32 %v587_v45, %v513_v25 }
 0x13e   : > { %v745_v19 = vpop.f32.mrf.mxu0 }
 0x13f   : > { %v825_v27 = vpop.f32.mrf.mxu1  ;;  %v756_v37 = vadd.f32 %v745_v19, %v675_v26  ;;  %v2468_v19 = vld [vmem:[%s3330_s2 + $0x58] sm:$0xff] }
 0x141   : > { %v836_v46 = vadd.f32 %v825_v27, %v756_v37  ;;  %v2460_v37 = vld [vmem:[%s3330_s2 + $0x18] sm:$0xff] }
 0x144   : > { %v589_v52 = vpop.f32.mrf.mxu2  ;;  %v667_v33 = vpop.f32.mrf.mxu3 }
 0x145   : > { %v676_v51 = vadd.f32 %v667_v33, %v596_v44 }
 0x146   : > { %v748_v29 = vpop.f32.mrf.mxu0 }
 0x147   : > { %v828_v54 = vpop.f32.mrf.mxu1  ;;  %v757_v62 = vadd.f32 %v748_v29, %v676_v51 }
 0x149   : > { %v837_v4 = vadd.f32 %v828_v54, %v757_v62 }
 0x14c   : > { %v899_v60 = vpop.f32.mrf.mxu2 }
 0x14d   : > { %v914_v3 = vadd.f32 %v899_v60, %v833_v61  ;;  %v669_v60 = vpop.f32.mrf.mxu3  ;;  %v597_v61 = vadd.f32 %v589_v52, %v515_v55 }
 0x14e   : > { %v750_v35 = vpop.f32.mrf.mxu0 }
 0x14f   : > { %v956_v8 = vmul.f32 %v929_v63, %v914_v3  ;;  %v677_v2 = vadd.f32 %v669_v60, %v597_v61 }
 0x151   : > { %v998_v17 = vadd.f32 %v971_v9, %v956_v8  ;;  %v758_v5 = vadd.f32 %v750_v35, %v677_v2  ;;  %v393_v8 = vlaneseq }
 0x153   : > { %v1004_v22 = vmax.f32 %v998_v17, 0.0 }
 0x154   : > { %v901_v12 = vpop.f32.mrf.mxu2 }
 0x155   : > { %v915_v14 = vadd.f32 %v901_v12, %v834_v7  ;;  %v830_v7 = vpop.f32.mrf.mxu1 }
 0x156   : > { %v838_v36 = vadd.f32 %v830_v7, %v758_v5 }
 0x157   : > { %v957_v18 = vmul.f32 %v934_v10, %v915_v14  ;;  %v1631_v14 = vld [vmem:[%s3334_s6 + $0x10] sm:$0xff] }
 0x159   : > { %v999_v24 = vadd.f32 %v976_v15, %v957_v18  ;;  %v1592_v15 = vld [vmem:[%s3333_s5 + $0x28] sm:$0xff] }
 0x15b   : > { %v1005_v23 = vmax.f32 %v999_v24, 0.0 }
 0x15c   : > { %v904_v28 = vpop.f32.mrf.mxu2 }
 0x15d   : > { %v2863_v32 = vpack.i.bf16 %v1005_v23, %v1004_v22  ;;  %v2325_v34 = vpack.c.bf16 %v1005_v23, %v1004_v22  ;;  %v916_v42 = vadd.f32 %v904_v28, %v835_v30  ;;  %v2466_v30 = vld [vmem:[%s3330_s2 + $0x48] sm:$0xff] }
 0x15f   : > { %v958_v40 = vmul.f32 %v939_v48, %v916_v42 }
 0x161   : > { %v1000_v58 = vadd.f32 %v981_v57, %v958_v40  ;;  %v2869_v57 = vand.u32 127, %v393_v8 }
 0x163   : > { %v1006_v3 = vmax.f32 %v1000_v58, 0.0  ;;  %vm1257_vm5 = vcmp.lt.s32.totalorder %v2869_v57, 8  ;;  %v1022_v33 = vadd.s32 4294967293, %v2869_v57  ;;  %v1182_v42 = vadd.s32 4294967295, %v2869_v57 }
 0x164   : > { %v906_v49 = vpop.f32.mrf.mxu2  ;;  %vm2318_vm6 = vmpackc.low %vm1257_vm5, %vm1257_vm5  ;;  %v1341_v25 = vadd.s32 1, %v2869_v57  ;;  %v1427_v5 = vadd.s32 2, %v2869_v57 }
 0x165   : > { %v917_v53 = vadd.f32 %v906_v49, %v836_v46  ;;  %vm1023_vm12 = vcmp.ge.s32.totalorder %v1022_v33, 0  ;;  %vm1024_vm13 = vcmp.lt.s32.totalorder %v1022_v33, 8  ;;  %vm1183_vm14 = vcmp.ge.s32.totalorder %v1182_v42, 0 }
 0x166   : > { %vm1184_vm15 = vcmp.lt.s32.totalorder %v1182_v42, 8  ;;  %vm1025_vm0 = vmand %vm1023_vm12, %vm1024_vm13  ;;  %vm1343_vm3 = vcmp.lt.s32.totalorder %v1341_v25, 8 }
 0x167   : > { %v959_v59 = vmul.f32 %v944_v50, %v917_v53  ;;  %vm1185_vm4 = vmand %vm1183_vm14, %vm1184_vm15 }
 0x169   : > { %v1001_v63 = vadd.f32 %v986_v56, %v959_v59 }
 0x16b   : > { %v1007_v31 = vmax.f32 %v1001_v63, 0.0 }
 0x16c   : > { %v909_v45 = vpop.f32.mrf.mxu2 }
 0x16d   : > { %v2498_v48 = vpack.i.bf16 %v1007_v31, %v1006_v3  ;;  %v918_v6 = vadd.f32 %v909_v45, %v837_v4 }
 0x16f   : > { %2499 = vrot.lane.b32.xlu0 %v2498_v48, %s2624_s20  ;;  %v960_v39 = vmul.f32 %v2853_v38, %v918_v6 }
 0x171   : > { %v1002_v56 = vadd.f32 %v2861_v47, %v960_v39  ;;  %v2322_v47 = vpack.c.bf16 %v1007_v31, %v1006_v3  ;;  %v2467_v31 = vld [vmem:[%s3330_s2 + $0x50] sm:$0xff] }
 0x173   : > { %v1008_v11 = vmax.f32 %v1002_v56, 0.0 }
 0x174   : > { %v911_v50 = vpop.f32.mrf.mxu2 }
 0x175   : > { %v919_v52 = vadd.f32 %v911_v50, %v838_v36 }
 0x177   : > { %v961_v9 = vmul.f32 %v2857_v41, %v919_v52  ;;  %v1587_v41 = vld [vmem:[%s3333_s5] sm:$0xff] }
 0x179   : > { %v1003_v10 = vadd.f32 %v2859_v43, %v961_v9  ;;  %v1629_v43 = vld [vmem:[%s3334_s6] sm:$0xff] }
 0x17b   : > { %v1009_v12 = vmax.f32 %v1003_v10, 0.0  ;;  %v2473_v10 = vld [vmem:[%s3330_s2 + $0x80] sm:$0xff] }
 0x17d   : > { %v2513_v13 = vpack.i.bf16 %v1009_v12, %v1008_v11  ;;  %v2319_v38 = vpack.c.bf16 %v1009_v12, %v1008_v11 }
 0x17f   : > { %2514 = vrot.lane.b32.xlu1 %v2513_v13, %s2625_s21  ;;  %2504 = vrot.lane.b32.xlu2 %v2513_v13, %s2624_s20 }
 0x180   : > { %2320 = vmatpush.bf16.msk.msra.mxu2 %vm2318_vm6, %v2319_v38  ;;  %2529 = vrot.lane.b32.xlu0 %v2513_v13, %s2626_s22  ;;  %v2457_v38 = vld [vmem:[%s3330_s2] sm:$0xff] }
 0x184   : > { %2323 = vmatpush.bf16.msk.msra.mxu2 %vm2318_vm6, %v2322_v47 }
 0x187   : > { %2519 = vrot.lane.b32.xlu1 %v2498_v48, %s2625_s21  ;;  %2509 = vrot.lane.b32.xlu2 %v2863_v32, %s2624_s20  ;;  %s2479_s20 = smul.u32 48, %s3363_s18 }
 0x188   : > { %2534 = vrot.lane.b32.xlu0 %v2863_v32, %s2625_s21  ;;  %2326 = vmatpush.bf16.msk.msra.mxu2 %vm2318_vm6, %v2325_v34  ;;  %vm2929_vm6 = vmpackc.low %vm1025_vm0, %vm1025_vm0 }
 0x18b   : > { %2327 = vmatmul.msk.bf16.vlgmr.msra.gmra.mxu2 %vm1088_vm11, %v2466_v30 }
 0x18f   : > { %2539 = vrot.lane.b32.xlu1 %v2863_v32, %s2626_s22  ;;  %2524 = vrot.lane.b32.xlu2 %v2498_v48, %s2626_s22  ;;  %s3299_s22 = scalar_lea.vmem %s3339_s11, %s2479_s20 }
 0x190   : > { %2544 = vrot.lane.b32.xlu0 %v2498_v48, %s2620_s24 }
 0x197   : > { %2549 = vrot.lane.b32.xlu1 %v2863_v32, %s2620_s24  ;;  %2559 = vrot.lane.b32.xlu2 %v2513_v13, %s2620_s24 }
 0x198   : > { %2574 = vrot.lane.b32.xlu0 %v2513_v13, %s2622_s30 }
 0x19b   : > { %2328 = vmatmul.msk.bf16.gmra.mxu2 %vm1088_vm11, %v2467_v31 }
 0x19f   : > { %2554 = vrot.lane.b32.xlu1 %v2498_v48, %s2621_s25  ;;  %2564 = vrot.lane.b32.xlu2 %v2513_v13, %s2621_s25 }
 0x1a0   : > { %2579 = vrot.lane.b32.xlu0 %v2863_v32, %s2621_s25 }
 0x1a7   : > { %2584 = vrot.lane.b32.xlu1 %v2863_v32, %s2622_s30  ;;  %2569 = vrot.lane.b32.xlu2 %v2498_v48, %s2622_s30  ;;  %v2461_v48 = vld [vmem:[%s3330_s2 + $0x20] sm:$0xff] }
 0x1ab   : > { %2329 = vmatmul.msk.bf16.gmra.mxu2 %vm1088_vm11, %v2468_v19 }
 0x1af   : > { %1876 = vrot.lane.b32.xlu2 %v2701_v0, %s2620_s24  ;;  %v1053_v0 = vadd.s32 4294967294, %v2869_v57 }
 0x1b1   : > { %vm1054_vm7 = vcmp.ge.s32.totalorder %v1053_v0, 0  ;;  %vm1055_vm8 = vcmp.lt.s32.totalorder %v1053_v0, 8 }
 0x1b2   : > { %vm1056_vm9 = vmand %vm1054_vm7, %vm1055_vm8 }
 0x1b3   : > { %vm2908_vm10 = vmpackc.low %vm1056_vm9, %vm1056_vm9  ;;  %vm1429_vm9 = vcmp.lt.s32.totalorder %v1427_v5, 8  ;;  %v1630_v5 = vld [vmem:[%s3334_s6 + $0x8] sm:$0xff] }
 0x1b4   : > { %vm2933_vm7 = vmpackc.low %vm1343_vm3, %vm1343_vm3 }
 0x1b5   : > { %vm2937_vm8 = vmpackc.low %vm1185_vm4, %vm1185_vm4 }
 0x1b7   : > { %1595 = vperm.xlu2 %2496, %v1587_v41  }
 0x1bf   : > { %1637 = vperm.xlu2 %2496, %v1629_v43  }
 0x1c7   : > { %1647 = vperm.xlu2 %2496, %v1631_v14  }
 0x1cf   : > { %1620 = vperm.xlu2 %2496, %v1592_v15  }
 0x1d9   : > { %v2505_v16 = vpop.permute.xlu2 %2504 }
 0x1da   : > { %v2507_v17 = vunpack.i.h.bf16 %v2505_v16  ;;  %v2506_v18 = vunpack.i.l.bf16 %v2505_v16 }
 0x1dc   : > { %v2235_v20 = vpack.c.bf16 %v2507_v17, %v2506_v18  ;;  %v2463_v17 = vld [vmem:[%s3330_s2 + $0x30] sm:$0xff]  ;;  %v1513_v18 = vadd.s32 3, %v2869_v57 }
 0x1de   : > { %2236 = vmatpush.bf16.msk.msra.mxu3 %vm2908_vm10, %v2235_v20  ;;  %vm1515_vm12 = vcmp.lt.s32.totalorder %v1513_v18, 8 }
 0x1df   : > { %vm2989_vm13 = vmpackc.low %vm1515_vm12, %vm1515_vm12 }
 0x1e1   : > { %v2500_v21 = vpop.permute.xlu0 %2499  ;;  %v2510_v24 = vpop.permute.xlu2 %2509 }
 0x1e2   : > { %v2502_v26 = vunpack.i.h.bf16 %v2500_v21  ;;  %v2501_v22 = vunpack.i.l.bf16 %v2500_v21  ;;  %v2512_v27 = vunpack.i.h.bf16 %v2510_v24  ;;  %v2511_v28 = vunpack.i.l.bf16 %v2510_v24  ;;  %v2462_v24 = vld [vmem:[%s3330_s2 + $0x28] sm:$0xff] }
 0x1e4   : > { %v2238_v23 = vpack.c.bf16 %v2502_v26, %v2501_v22  ;;  %v2241_v32 = vpack.c.bf16 %v2512_v27, %v2511_v28 }
 0x1e6   : > { %2239 = vmatpush.bf16.msk.msra.mxu3 %vm2908_vm10, %v2238_v23 }
 0x1e9   : > { %v2525_v34 = vpop.permute.xlu2 %2524 }
 0x1ea   : > { %2242 = vmatpush.bf16.msk.msra.mxu3 %vm2908_vm10, %v2241_v32  ;;  %v2527_v63 = vunpack.i.h.bf16 %v2525_v34  ;;  %v2526_v2 = vunpack.i.l.bf16 %v2525_v34  ;;  %vm2960_vm10 = vmpackc.low %vm1429_vm9, %vm1429_vm9 }
 0x1ec   : > { %v2292_v35 = vpack.c.bf16 %v2527_v63, %v2526_v2  ;;  %v2469_v63 = vld [vmem:[%s3330_s2 + $0x60] sm:$0xff] }
 0x1ed   : > { %2243 = vmatmul.msk.bf16.vlgmr.msra.gmra.mxu3 %vm1088_vm11, %v2460_v37 }
 0x1f1   : > { %v2515_v29 = vpop.permute.xlu1 %2514  ;;  %v2560_v44 = vpop.permute.xlu2 %2559 }
 0x1f2   : > { %v2517_v46 = vunpack.i.h.bf16 %v2515_v29  ;;  %v2516_v40 = vunpack.i.l.bf16 %v2515_v29  ;;  %v2530_v49 = vpop.permute.xlu0 %2529  ;;  %v2562_v51 = vunpack.i.h.bf16 %v2560_v44  ;;  %v2561_v53 = vunpack.i.l.bf16 %v2560_v44 }
 0x1f3   : > { %v2532_v55 = vunpack.i.h.bf16 %v2530_v49  ;;  %v2531_v58 = vunpack.i.l.bf16 %v2530_v49 }
 0x1f4   : > { %v2259_v60 = vpack.c.bf16 %v2517_v46, %v2516_v40  ;;  %v2349_v61 = vpack.c.bf16 %v2562_v51, %v2561_v53  ;;  %v2458_v40 = vld [vmem:[%s3330_s2 + $0x8] sm:$0xff] }
 0x1f5   : > { %v2289_v3 = vpack.c.bf16 %v2532_v55, %v2531_v58  ;;  %v2464_v58 = vld [vmem:[%s3330_s2 + $0x38] sm:$0xff] }
 0x1f6   : > { %2260 = vmatpush.bf16.msk.msra.mxu0 %vm2929_vm6, %v2259_v60  ;;  %2350 = vmatpush.bf16.msk.msrb.mxu3 %vm2933_vm7, %v2349_v61 }
 0x1f7   : > { %2290 = vmatpush.bf16.msk.msra.mxu1 %vm2937_vm8, %v2289_v3 }
 0x1f9   : > { %v2520_v45 = vpop.permute.xlu1 %2519  ;;  %v2565_v4 = vpop.permute.xlu2 %2564 }
 0x1fa   : > { %v2522_v6 = vunpack.i.h.bf16 %v2520_v45  ;;  %v2521_v7 = vunpack.i.l.bf16 %v2520_v45  ;;  %v2535_v8 = vpop.permute.xlu0 %2534  ;;  %v2567_v52 = vunpack.i.h.bf16 %v2565_v4  ;;  %v2566_v56 = vunpack.i.l.bf16 %v2565_v4  ;;  %v1588_v45 = vld [vmem:[%s3333_s5 + $0x8] sm:$0xff]  ;;  %v2459_v4 = vld [vmem:[%s3330_s2 + $0x10] sm:$0xff] }
 0x1fb   : > { %2293 = vmatpush.bf16.msk.msra.mxu1 %vm2937_vm8, %v2292_v35  ;;  %v2537_v39 = vunpack.i.h.bf16 %v2535_v8  ;;  %v2536_v50 = vunpack.i.l.bf16 %v2535_v8  ;;  %v1589_v35 = vld [vmem:[%s3333_s5 + $0x10] sm:$0xff]  ;;  %v1632_v8 = vld [vmem:[%s3334_s6 + $0x18] sm:$0xff] }
 0x1fc   : > { %v2262_v36 = vpack.c.bf16 %v2522_v6, %v2521_v7  ;;  %v2379_v11 = vpack.c.bf16 %v2567_v52, %v2566_v56  ;;  %v2465_v6 = vld [vmem:[%s3330_s2 + $0x40] sm:$0xff]  ;;  %v2470_v7 = vld [vmem:[%s3330_s2 + $0x68] sm:$0xff]  ;;  %v2475_v56 = vld [vmem:[%s3330_s2 + $0x90] sm:$0xff] }
 0x1fd   : > { %2244 = vmatmul.msk.bf16.gmra.mxu3 %vm1088_vm11, %v2461_v48  ;;  %v2265_v9 = vpack.c.bf16 %v2537_v39, %v2536_v50  ;;  %v1590_v48 = vld [vmem:[%s3333_s5 + $0x18] sm:$0xff]  ;;  %v1634_v50 = vld [vmem:[%s3334_s6 + $0x28] sm:$0xff]  ;;  %v1633_v52 = vld [vmem:[%s3334_s6 + $0x20] sm:$0xff] }
 0x1fe   : > { %2263 = vmatpush.bf16.msk.msra.mxu0 %vm2929_vm6, %v2262_v36  ;;  %v1591_v36 = vld [vmem:[%s3333_s5 + $0x20] sm:$0xff]  ;;  %v2472_v39 = vld [vmem:[%s3330_s2 + $0x78] sm:$0xff] }
 0x201   : > { %v2540_v12 = vpop.permute.xlu1 %2539  ;;  %v2570_v13 = vpop.permute.xlu2 %2569 }
 0x202   : > { %v2542_v47 = vunpack.i.h.bf16 %v2540_v12  ;;  %v2541_v41 = vunpack.i.l.bf16 %v2540_v12  ;;  %v2545_v43 = vpop.permute.xlu0 %2544  ;;  %2266 = vmatpush.bf16.msk.msra.mxu0 %vm2929_vm6, %v2265_v9  ;;  %v2572_v37 = vunpack.i.h.bf16 %v2570_v13  ;;  %v2571_v42 = vunpack.i.l.bf16 %v2570_v13  ;;  %v2471_v9 = vld [vmem:[%s3330_s2 + $0x70] sm:$0xff]  ;;  %v2474_v12 = vld [vmem:[%s3330_s2 + $0x88] sm:$0xff]  ;;  %v2477_v13 = vld [vmem:[%s3330_s2 + $0xa0] sm:$0xff] }
 0x203   : > { %v2547_v14 = vunpack.i.h.bf16 %v2545_v43  ;;  %v2546_v15 = vunpack.i.l.bf16 %v2545_v43 }
 0x204   : > { %v2295_v0 = vpack.c.bf16 %v2542_v47, %v2541_v41  ;;  %v2412_v44 = vpack.c.bf16 %v2572_v37, %v2571_v42 }
 0x205   : > { %v2352_v16 = vpack.c.bf16 %v2547_v14, %v2546_v15  ;;  %2267 = vmatmul.msk.bf16.vlgmr.msra.gmra.mxu0 %vm1088_vm11, %v2457_v38 }
 0x206   : > { %2380 = vmatpush.bf16.msk.msrb.mxu0 %vm2960_vm10, %v2379_v11  ;;  %2296 = vmatpush.bf16.msk.msra.mxu1 %vm2937_vm8, %v2295_v0  ;;  %v2476_v11 = vld [vmem:[%s3330_s2 + $0x98] sm:$0xff] }
 0x207   : > { %2353 = vmatpush.bf16.msk.msrb.mxu3 %vm2933_vm7, %v2352_v16 }
 0x209   : > { %v2550_v20 = vpop.permute.xlu1 %2549  ;;  %v1877_v21 = vpop.permute.xlu2 %1876  ;;  %2297 = vmatmul.msk.bf16.vlgmr.msra.gmra.mxu1 %vm1088_vm11, %v2463_v17 }
 0x20a   : > { %v2552_v26 = vunpack.i.h.bf16 %v2550_v20  ;;  %v2551_v22 = vunpack.i.l.bf16 %v2550_v20  ;;  %v2575_v23 = vpop.permute.xlu0 %2574  ;;  %v1878_v27 = vrot.slane %v1877_v21, 4 }
 0x20b   : > { %v2577_v28 = vunpack.i.h.bf16 %v2575_v23  ;;  %v2576_v30 = vunpack.i.l.bf16 %v2575_v23 }
 0x20c   : > { %v2355_v32 = vpack.c.bf16 %v2552_v26, %v2551_v22  ;;  %v1880_v33 = vsel %vm554_vm2, %v1877_v21, %v1878_v27 }
 0x20d   : > { %v2409_v25 = vpack.c.bf16 %v2577_v28, %v2576_v30  ;;  %v1882_v29 = vmax.f32 %v2704_v1, %v1880_v33  ;;  %2245 = vmatmul.msk.bf16.gmra.mxu3 %vm1088_vm11, %v2462_v24 }
 0x20e   : > { %2356 = vmatpush.bf16.msk.msrb.mxu3 %vm2933_vm7, %v2355_v32  ;;  %v1308_v28 = vpop.f32.mrf.mxu2 }
 0x20f   : > { %1926 = vst [vmem:[#allocation1] ss:$2 sm:$0xff] %v1882_v29  ;;  %2410 = vmatpush.bf16.msk.msrb.mxu1 %vm2989_vm13, %v2409_v25 }
 0x211   : > { %v2555_v46 = vpop.permute.xlu1 %2554  ;;  %v1596_v29 = vpop.permute.xlu2 %1595 }
 0x212   : > { %v2557_v49 = vunpack.i.h.bf16 %v2555_v46  ;;  %v2556_v51 = vunpack.i.l.bf16 %v2555_v46  ;;  %v2580_v53 = vpop.permute.xlu0 %2579 }
 0x213   : > { %2413 = vmatpush.bf16.msk.msrb.mxu1 %vm2989_vm13, %v2412_v44  ;;  %v2582_v54 = vunpack.i.h.bf16 %v2580_v53  ;;  %v2581_v55 = vunpack.i.l.bf16 %v2580_v53  ;;  %v1883_v44 = vld [vmem:[%s3337_s9] sm:$0xff] }
 0x214   : > { %v2382_v1 = vpack.c.bf16 %v2557_v49, %v2556_v51 }
 0x215   : > { %2268 = vmatmul.msk.bf16.gmra.mxu0 %vm1088_vm11, %v2458_v40  ;;  %v2385_v61 = vpack.c.bf16 %v2582_v54, %v2581_v55 }
 0x216   : > { %2383 = vmatpush.bf16.msk.msrb.mxu0 %vm2960_vm10, %v2382_v1  ;;  %v1928_v59 = vld.sshfl [vmem:[#allocation1 + $0x8] sm:$0xff pattern:$0x75316420]  ;;  %v1927_v60 = vld.sshfl [vmem:[#allocation1] sm:$0xff pattern:$0x75316420]  ;;  %v1310_v42 = vpop.f32.mrf.mxu2 }
 0x217   : > { %1931 = vrot.lane.b32.xlu1 %v1928_v59, %s2620_s24  ;;  %1929 = vrot.lane.b32.xlu0 %v1927_v60, %s2620_s24  ;;  %v1884_v60 = vld [vmem:[%s3337_s9 + $0x8] sm:$0xff] }
 0x219   : > { %v2585_v62 = vpop.permute.xlu1 %2584  ;;  %2298 = vmatmul.msk.bf16.gmra.mxu1 %vm1088_vm11, %v2464_v58 }
 0x21a   : > { %v2587_v2 = vunpack.i.h.bf16 %v2585_v62  ;;  %v2586_v3 = vunpack.i.l.bf16 %v2585_v62  ;;  %2386 = vmatpush.bf16.msk.msrb.mxu0 %vm2960_vm10, %v2385_v61  ;;  %v1638_v62 = vpop.permute.xlu2 %1637 }
 0x21c   : > { %v2415_v31 = vpack.c.bf16 %v2587_v2, %v2586_v3 }
 0x21d   : > { %2357 = vmatmul.msk.bf16.vlgmr.msrb.gmra.mxu3 %vm1088_vm11, %v2469_v63 }
 0x21e   : > { %2416 = vmatpush.bf16.msk.msrb.mxu1 %vm2989_vm13, %v2415_v31  ;;  %v1313_v58 = vpop.f32.mrf.mxu2 }
 0x21f   : > { %1605 = vperm.xlu1 %2495, %v1589_v35   ;;  %1600 = vperm.xlu0 %2497, %v1588_v45  }
 0x225   : > { %2269 = vmatmul.msk.bf16.gmra.mxu0 %vm1088_vm11, %v2459_v4 }
 0x227   : > { %1610 = vperm.xlu1 %2495, %v1590_v48   ;;  %1642 = vperm.xlu0 %2497, %v1630_v5  }
 0x229   : > { %2299 = vmatmul.msk.bf16.gmra.mxu1 %vm1088_vm11, %v2465_v6 }
 0x22d   : > { %2358 = vmatmul.msk.bf16.gmra.mxu3 %vm1088_vm11, %v2470_v7 }
 0x22f   : > { %1652 = vperm.xlu1 %2495, %v1632_v8   ;;  %1615 = vperm.xlu0 %2497, %v1591_v36  }
 0x235   : > { %2387 = vmatmul.msk.bf16.vlgmr.msrb.gmra.mxu0 %vm1088_vm11, %v2472_v39 }
 0x237   : > { %1662 = vperm.xlu1 %2495, %v1634_v50   ;;  %1657 = vperm.xlu0 %2497, %v1633_v52   ;;  %v1315_v50 = vpop.f32.mrf.mxu2 }
 0x239   : > { %2417 = vmatmul.msk.bf16.vlgmr.msrb.gmra.mxu1 %vm1088_vm11, %v2475_v56 }
 0x23d   : > { %2359 = vmatmul.msk.bf16.gmra.mxu3 %vm1088_vm11, %v2471_v9 }
 0x245   : > { %2388 = vmatmul.msk.bf16.gmra.mxu0 %vm1088_vm11, %v2473_v10 }
 0x249   : > { %2418 = vmatmul.msk.bf16.gmra.mxu1 %vm1088_vm11, %v2476_v11 }
 0x255   : > { %2389 = vmatmul.msk.bf16.gmra.mxu0 %vm1088_vm11, %v2474_v12 }
 0x259   : > { %2419 = vmatmul.msk.bf16.gmra.mxu1 %vm1088_vm11, %v2477_v13  ;;  %vm1952_vm11 = vcmask 1043456  }
 0x270   : > { %v1107_v38 = vpop.f32.mrf.mxu3 }
 0x278   : > { %v1109_v47 = vpop.f32.mrf.mxu3 }
 0x280   : > { %v1112_v41 = vpop.f32.mrf.mxu3 }
 0x282   : > { %v1155_v43 = vpop.f32.mrf.mxu0 }
 0x283   : > { %v1156_v34 = vadd.f32 %v1155_v43, %v1107_v38 }
 0x286   : > { %v1235_v14 = vpop.f32.mrf.mxu1 }
 0x287   : > { %v1250_v37 = vadd.f32 %v1235_v14, %v1156_v34 }
 0x288   : > { %v1114_v15 = vpop.f32.mrf.mxu3 }
 0x289   : > { %v1932_v24 = vpop.permute.xlu1 %1931  ;;  %v1930_v26 = vpop.permute.xlu0 %1929  ;;  %v1323_v40 = vadd.f32 %v1308_v28, %v1250_v37 }
 0x28a   : > { %v1157_v0 = vpop.f32.mrf.mxu0  ;;  %v1933_v23 = vsel %vm554_vm2, %v1930_v26, %v1932_v24  ;;  %vm1707_vm2 = vcmask 23552  }
 0x28b   : > { %2426 = vmatpush.msk.msrb.mxu2 %vm1952_vm11, %v1933_v23  ;;  %v1158_v51 = vadd.f32 %v1157_v0, %v1109_v47  ;;  %v1885_v0 = vld [vmem:[%s3337_s9 + $0x10] sm:$0xff]  ;;  %v1318_v23 = vpop.f32.mrf.mxu2 }
 0x28c   : > { %2427 = vmatmul.msk.f32.vlgmr.msrb.gmra.mxu2 %vm428_vm1, %v1883_v44 }
 0x28e   : > { %v1237_v16 = vpop.f32.mrf.mxu1 }
 0x28f   : > { %v1251_v1 = vadd.f32 %v1237_v16, %v1158_v51 }
 0x290   : > { %v3085_v17 = vpop.f32.mrf.mxu3 }
 0x291   : > { %v1601_v61 = vpop.permute.xlu0 %1600  ;;  %v1324_v63 = vadd.f32 %v1310_v42, %v1251_v1  ;;  %v1606_v7 = vpop.permute.xlu1 %1605 }
 0x292   : > { %v1160_v18 = vpop.f32.mrf.mxu0 }
 0x293   : > { %v1161_v35 = vadd.f32 %v1160_v18, %v1112_v41 }
 0x294   : > { %2428 = vmatmul.msk.f32.gmra.mxu2 %vm428_vm1, %v1884_v60 }
 0x296   : > { %v1240_v19 = vpop.f32.mrf.mxu1 }
 0x297   : > { %v1252_v48 = vadd.f32 %v1240_v19, %v1161_v35  ;;  %v1648_v19 = vpop.permute.xlu2 %1647 }
 0x298   : > { %v3087_v21 = vpop.f32.mrf.mxu3 }
 0x299   : > { %v1325_v39 = vadd.f32 %v1313_v58, %v1252_v48  ;;  %v1643_v56 = vpop.permute.xlu0 %1642  ;;  %v1611_v16 = vpop.permute.xlu1 %1610 }
 0x29a   : > { %v1162_v20 = vpop.f32.mrf.mxu0 }
 0x29b   : > { %v1163_v10 = vadd.f32 %v1162_v20, %v1114_v15 }
 0x29c   : > { %2429 = vmatmul.msk.f32.gmra.mxu2 %vm428_vm1, %v1885_v0 }
 0x29e   : > { %v1242_v22 = vpop.f32.mrf.mxu1 }
 0x29f   : > { %v1253_v38 = vadd.f32 %v1242_v22, %v1163_v10 }
 0x2a0   : > { %v1394_v30 = vpop.f32.mrf.mxu3 }
 0x2a1   : > { %v1409_v53 = vadd.f32 %v1394_v30, %v1323_v40  ;;  %v1326_v15 = vadd.f32 %v1315_v50, %v1253_v38  ;;  %v1616_v44 = vpop.permute.xlu0 %1615 }
 0x2a2   : > { %v3090_v27 = vpop.f32.mrf.mxu0 }
 0x2a3   : > { %v1166_v24 = vadd.f32 %v3090_v27, %v3085_v17 }
 0x2a6   : > { %v3092_v32 = vpop.f32.mrf.mxu1 }
 0x2a7   : > { %v1254_v28 = vadd.f32 %v3092_v32, %v1166_v24 }
 0x2a8   : > { %v1396_v46 = vpop.f32.mrf.mxu3 }
 0x2a9   : > { %v1410_v45 = vadd.f32 %v1396_v46, %v1324_v63  ;;  %v1327_v46 = vadd.f32 %v1318_v23, %v1254_v28  ;;  %v1658_v63 = vpop.permute.xlu0 %1657 }
 0x2aa   : > { %v3094_v33 = vpop.f32.mrf.mxu0 }
 0x2ab   : > { %v1168_v27 = vadd.f32 %v3094_v33, %v3087_v21 }
 0x2ae   : > { %v3096_v25 = vpop.f32.mrf.mxu1 }
 0x2af   : > { %v1255_v32 = vadd.f32 %v3096_v25, %v1168_v27 }
 0x2b0   : > { %v1399_v3 = vpop.f32.mrf.mxu3 }
 0x2b1   : > { %v1411_v11 = vadd.f32 %v1399_v3, %v1325_v39  ;;  %v1891_v39 = vld [vmem:[%s3338_s10 + $0x10] sm:$0xff] }
 0x2b2   : > { %v1480_v49 = vpop.f32.mrf.mxu0 }
 0x2b3   : > { %v1495_v54 = vadd.f32 %v1480_v49, %v1409_v53  ;;  %v1653_v49 = vpop.permute.xlu1 %1652 }
 0x2b6   : > { %v1566_v55 = vpop.f32.mrf.mxu1 }
 0x2b7   : > { %v1581_v59 = vadd.f32 %v1566_v55, %v1495_v54  ;;  %v1320_v55 = vpop.f32.mrf.mxu2 }
 0x2b8   : > { %v1401_v13 = vpop.f32.mrf.mxu3 }
 0x2b9   : > { %v1623_v2 = vmul.f32 %v1596_v29, %v1581_v59  ;;  %v1412_v26 = vadd.f32 %v1401_v13, %v1326_v15  ;;  %v1696_v13 = vld [vmem:[%s3335_s7 + $0x8] sm:$0xff] }
 0x2ba   : > { %v1482_v31 = vpop.f32.mrf.mxu0  ;;  %v1888_v15 = vld [vmem:[%s3337_s9 + $0x28] sm:$0xff] }
 0x2bb   : > { %v3106_v4 = vadd.f32 %v1638_v62, %v1623_v2  ;;  %v1496_v5 = vadd.f32 %v1482_v31, %v1410_v45  ;;  %v1621_v45 = vpop.permute.xlu2 %1620 }
 0x2bd   : > { %v1671_v6 = vsel %vm1257_vm5, %v3106_v4, 0.0 }
 0x2be   : > { %v1568_v8 = vpop.f32.mrf.mxu1  ;;  %1677 = vadd.xlane.f32.xlu2 %v1671_v6 }
 0x2bf   : > { %v1582_v36 = vadd.f32 %v1568_v8, %v1496_v5  ;;  %v1663_v5 = vpop.permute.xlu1 %1662 }
 0x2c0   : > { %v1404_v37 = vpop.f32.mrf.mxu3 }
 0x2c1   : > { %v1624_v52 = vmul.f32 %v1601_v61, %v1582_v36  ;;  %v1413_v51 = vadd.f32 %v1404_v37, %v1327_v46  ;;  %v1328_v61 = vadd.f32 %v1320_v55, %v1255_v32  ;;  %v1890_v36 = vld [vmem:[%s3338_s10 + $0x8] sm:$0xff] }
 0x2c2   : > { %v1485_v9 = vpop.f32.mrf.mxu0  ;;  %v1700_v46 = vld [vmem:[%s3335_s7 + $0x28] sm:$0xff] }
 0x2c3   : > { %v3111_v12 = vadd.f32 %v1643_v56, %v1624_v52  ;;  %v1497_v47 = vadd.f32 %v1485_v9, %v1411_v11  ;;  %v1886_v52 = vld [vmem:[%s3337_s9 + $0x18] sm:$0xff]  ;;  %v1887_v9 = vld [vmem:[%s3337_s9 + $0x20] sm:$0xff] }
 0x2c4   : > { %2430 = vmatmul.msk.f32.gmra.mxu2 %vm428_vm1, %v1886_v52 }
 0x2c5   : > { %v1672_v41 = vsel %vm1257_vm5, %v3111_v12, 0.0 }
 0x2c6   : > { %v1571_v43 = vpop.f32.mrf.mxu1  ;;  %1679 = vadd.xlane.f32.xlu0 %v1672_v41  ;;  %v1695_v41 = vld [vmem:[%s3335_s7] sm:$0xff] }
 0x2c7   : > { %v1583_v14 = vadd.f32 %v1571_v43, %v1497_v47  ;;  %v1697_v43 = vld [vmem:[%s3335_s7 + $0x10] sm:$0xff] }
 0x2c8   : > { %v1406_v60 = vpop.f32.mrf.mxu3 }
 0x2c9   : > { %v1625_v18 = vmul.f32 %v1606_v7, %v1583_v14  ;;  %v1414_v21 = vadd.f32 %v1406_v60, %v1328_v61  ;;  %v1889_v7 = vld [vmem:[%s3338_s10] sm:$0xff] }
 0x2ca   : > { %v1487_v20 = vpop.f32.mrf.mxu0 }
 0x2cb   : > { %v3122_v22 = vadd.f32 %v1648_v19, %v1625_v18  ;;  %v1498_v30 = vadd.f32 %v1487_v20, %v1412_v26  ;;  %v1698_v18 = vld [vmem:[%s3335_s7 + $0x18] sm:$0xff]  ;;  %v1699_v26 = vld [vmem:[%s3335_s7 + $0x20] sm:$0xff] }
 0x2cc   : > { %2431 = vmatmul.msk.f32.gmra.mxu2 %vm428_vm1, %v1887_v9 }
 0x2cd   : > { %v1673_v34 = vsel %vm1257_vm5, %v3122_v22, 0.0 }
 0x2ce   : > { %v1573_v42 = vpop.f32.mrf.mxu1  ;;  %1681 = vadd.xlane.f32.xlu1 %v1673_v34 }
 0x2cf   : > { %v1584_v29 = vadd.f32 %v1573_v42, %v1498_v30 }
 0x2d1   : > { %v1626_v40 = vmul.f32 %v1611_v16, %v1584_v29 }
 0x2d2   : > { %v1490_v17 = vpop.f32.mrf.mxu0 }
 0x2d3   : > { %v3130_v53 = vadd.f32 %v1653_v49, %v1626_v40  ;;  %v1499_v1 = vadd.f32 %v1490_v17, %v1413_v51 }
 0x2d4   : > { %2432 = vmatmul.msk.f32.gmra.mxu2 %vm428_vm1, %v1888_v15 }
 0x2d5   : > { %v1674_v54 = vsel %vm1257_vm5, %v3130_v53, 0.0 }
 0x2d6   : > { %v1576_v58 = vpop.f32.mrf.mxu1  ;;  %1683 = vadd.xlane.f32.xlu2 %v1674_v54 }
 0x2d7   : > { %v1585_v59 = vadd.f32 %v1576_v58, %v1499_v1 }
 0x2d9   : > { %v1627_v62 = vmul.f32 %v1616_v44, %v1585_v59 }
 0x2da   : > { %v1492_v2 = vpop.f32.mrf.mxu0 }
 0x2db   : > { %v3136_v33 = vadd.f32 %v1658_v63, %v1627_v62  ;;  %v1500_v3 = vadd.f32 %v1492_v2, %v1414_v21  ;;  %v1728_v63 = vld [vmem:[%s3336_s8 + $0x10] sm:$0xff]  ;;  %v1727_v2 = vld [vmem:[%s3336_s8 + $0x8] sm:$0xff]  ;;  %v1726_v21 = vld [vmem:[%s3336_s8] sm:$0xff] }
 0x2dd   : > { %v1675_v25 = vsel %vm1257_vm5, %v3136_v33, 0.0 }
 0x2de   : > { %v1578_v31 = vpop.f32.mrf.mxu1  ;;  %1685 = vadd.xlane.f32.xlu2 %v1675_v25 }
 0x2df   : > { %v1586_v35 = vadd.f32 %v1578_v31, %v1500_v3 }
 0x2e1   : > { %v1628_v48 = vmul.f32 %v1621_v45, %v1586_v35 }
 0x2e3   : > { %v3141_v6 = vadd.f32 %v1663_v5, %v1628_v48 }
 0x2e5   : > { %v1676_v8 = vsel %vm1257_vm5, %v3141_v6, 0.0 }
 0x2e6   : > { %1687 = vadd.xlane.f32.xlu0 %v1676_v8  ;;  %v1730_v8 = vld [vmem:[%s3336_s8 + $0x20] sm:$0xff] }
 0x2e7   : > { %1897 = vperm.xlu1 %2495, %v1889_v7   ;;  %v1731_v7 = vld [vmem:[%s3336_s8 + $0x28] sm:$0xff] }
 0x2f6   : > { %1902 = vperm.xlu2 %2496, %v1890_v36   ;;  %v1729_v36 = vld [vmem:[%s3336_s8 + $0x18] sm:$0xff] }
 0x2fa   : > { %1907 = vperm.xlu0 %2497, %v1891_v39  }
 0x331   : > { %v1678_v50 = vpop.xlane.xlu2 %1677 }
 0x332   : > { %v1689_v38 = vmul.f32 0.125, %v1678_v50 }
 0x334   : > { %v1701_v19 = vmul.f32 %v1695_v41, %v1689_v38  ;;  %v1972_v38 = vpop.f32.mrf.mxu2 }
 0x336   : > { %v1708_v30 = vsel %vm1707_vm2, %v1701_v19, 0.0 }
 0x339   : > { %v1680_v56 = vpop.xlane.xlu0 %1679 }
 0x33a   : > { %v1690_v11 = vmul.f32 0.125, %v1680_v56 }
 0x33c   : > { %v1702_v14 = vmul.f32 %v1696_v13, %v1690_v11  ;;  %v1894_v11 = vld [vmem:[%s3338_s10 + $0x28] sm:$0xff]  ;;  %v1892_v13 = vld [vmem:[%s3338_s10 + $0x18] sm:$0xff]  ;;  %v1975_v19 = vpop.f32.mrf.mxu2 }
 0x33e   : > { %v1709_v23 = vsel %vm1707_vm2, %v1702_v14, 0.0 }
 0x33f   : > { %v1710_v42 = vadd.f32 %v1709_v23, %v1708_v30 }
 0x341   : > { %v1682_v10 = vpop.xlane.xlu1 %1681 }
 0x342   : > { %v1691_v47 = vmul.f32 0.125, %v1682_v10  ;;  %v1893_v10 = vld [vmem:[%s3338_s10 + $0x20] sm:$0xff] }
 0x344   : > { %v1703_v20 = vmul.f32 %v1697_v43, %v1691_v47 }
 0x346   : > { %v1711_v34 = vsel %vm1707_vm2, %v1703_v20, 0.0 }
 0x347   : > { %v1712_v44 = vadd.f32 %v1711_v34, %v1710_v42 }
 0x349   : > { %v1684_v57 = vpop.xlane.xlu2 %1683 }
 0x34a   : > { %v1692_v0 = vmul.f32 0.125, %v1684_v57 }
 0x34c   : > { %v1704_v28 = vmul.f32 %v1698_v18, %v1692_v0 }
 0x34e   : > { %v1713_v29 = vsel %vm1707_vm2, %v1704_v28, 0.0 }
 0x34f   : > { %v1714_v27 = vadd.f32 %v1713_v29, %v1712_v44 }
 0x351   : > { %v1686_v16 = vpop.xlane.xlu2 %1685 }
 0x352   : > { %v1693_v24 = vmul.f32 0.125, %v1686_v16 }
 0x354   : > { %v1705_v37 = vmul.f32 %v1699_v26, %v1693_v24 }
 0x356   : > { %v1715_v49 = vsel %vm1707_vm2, %v1705_v37, 0.0  ;;  %v1978_v37 = vpop.f32.mrf.mxu2 }
 0x357   : > { %v1716_v32 = vadd.f32 %v1715_v49, %v1714_v27 }
 0x359   : > { %v1688_v40 = vpop.xlane.xlu0 %1687  ;;  %v1903_v47 = vpop.permute.xlu2 %1902 }
 0x35a   : > { %v1694_v17 = vmul.f32 0.125, %v1688_v40  ;;  %v1898_v43 = vpop.permute.xlu1 %1897 }
 0x35c   : > { %v1706_v51 = vmul.f32 %v1700_v46, %v1694_v17 }
 0x35e   : > { %v1717_v1 = vsel %vm1707_vm2, %v1706_v51, 0.0 }
 0x35f   : > { %v1718_v54 = vadd.f32 %v1717_v1, %v1716_v32  ;;  %v3227_v32 = vadd.f32 %v1972_v38, %v1898_v43 }
 0x361   : > { %v1719_v55 = vrot.slane %v1718_v54, 4 }
 0x363   : > { %v1720_v58 = vadd.f32 %v1719_v55, %v1718_v54  ;;  %v3229_v54 = vadd.f32 %v1975_v19, %v1903_v47  ;;  %v3231_v55 = vpop.f32.mrf.mxu2 }
 0x365   : > { %v1721_v59 = vrot.slane %v1720_v58, 2 }
 0x367   : > { %v1722_v60 = vadd.f32 %v1721_v59, %v1720_v58 }
 0x369   : > { %v1723_v61 = vrot.slane %v1722_v60, 1 }
 0x36b   : > { %v1724_v62 = vadd.f32 %v1723_v61, %v1722_v60  ;;  %v1984_v19 = vpop.f32.mrf.mxu2 }
 0x36c   : > { %v1908_v41 = vpop.permute.xlu0 %1907 }
 0x36d   : > { %v1725_v3 = vmax.f32 %v1724_v62, 0.0  ;;  %v3235_v62 = vadd.f32 %v1978_v37, %v1908_v41 }
 0x36f   : > { %v1734_v25 = vmul.f32 %v1728_v63, %v1725_v3  ;;  %v1733_v31 = vmul.f32 %v1727_v2, %v1725_v3  ;;  %v1732_v35 = vmul.f32 %v1726_v21, %v1725_v3  ;;  %v1737_v39 = vmul.f32 %v1731_v7, %v1725_v3 }
 0x370   : > { %v1736_v50 = vmul.f32 %v1730_v8, %v1725_v3  ;;  %v1735_v52 = vmul.f32 %v1729_v36, %v1725_v3 }
 0x371   : > { %v1744_v45 = vsel %vm1707_vm2, %v1734_v25, 0.0  ;;  %v1741_v48 = vsel %vm1707_vm2, %v1733_v31, 0.0  ;;  %v1738_v5 = vsel %vm1707_vm2, %v1732_v35, 0.0  ;;  %v1753_v57 = vsel %vm1707_vm2, %v1737_v39, 0.0 }
 0x372   : > { %1745 = vadd.xlane.f32.xlu0 %v1744_v45  ;;  %1742 = vadd.xlane.f32.xlu2 %v1741_v48  ;;  %v1750_v56 = vsel %vm1707_vm2, %v1736_v50, 0.0  ;;  %v1747_v9 = vsel %vm1707_vm2, %v1735_v52, 0.0 }
 0x373   : > { %1739 = vadd.xlane.f32.xlu1 %v1738_v5 }
 0x37a   : > { %1754 = vadd.xlane.f32.xlu0 %v1753_v57  ;;  %1751 = vadd.xlane.f32.xlu2 %v1750_v56 }
 0x37b   : > { %1748 = vadd.xlane.f32.xlu1 %v1747_v9 }
 0x38e   : > { %1917 = vperm.xlu0 %2497, %v1893_v10  }
 0x392   : > { %1922 = vperm.xlu2 %2496, %v1894_v11  }
 0x394   : > { %1912 = vperm.xlu1 %2495, %v1892_v13  }
 0x3e5   : > { %v1743_v14 = vpop.xlane.xlu2 %1742  ;;  %v1746_v0 = vpop.xlane.xlu0 %1745 }
 0x3e6   : > { %v2421_v16 = vmul.f32 -1.442695, %v1743_v14  ;;  %v1740_v15 = vpop.xlane.xlu1 %1739  ;;  %v2422_v18 = vmul.f32 -1.442695, %v1746_v0 }
 0x3e7   : > { %v2420_v20 = vmul.f32 -1.442695, %v1740_v15 }
 0x3e8   : > { %2588 = vpow2.f32 %v2421_v16 }
 0x3e9   : > { %2590 = vpow2.f32 %v2420_v20 }
 0x3ea   : > { %2592 = vpow2.f32 %v2422_v18 }
 0x3ed   : > { %v1752_v24 = vpop.xlane.xlu2 %1751  ;;  %v1755_v26 = vpop.xlane.xlu0 %1754 }
 0x3ee   : > { %v2589_v23 = vpop.eup %2588  ;;  %v2424_v28 = vmul.f32 -1.442695, %v1752_v24  ;;  %v1749_v30 = vpop.xlane.xlu1 %1748  ;;  %v2425_v40 = vmul.f32 -1.442695, %v1755_v26 }
 0x3ef   : > { %v2591_v34 = vpop.eup %2590  ;;  %v1775_v42 = vadd.f32 1.0, %v2589_v23  ;;  %v2423_v29 = vmul.f32 -1.442695, %v1749_v30 }
 0x3f0   : > { %v2593_v44 = vpop.eup %2592  ;;  %v1774_v46 = vadd.f32 1.0, %v2591_v34  ;;  %2594 = vpow2.f32 %v2424_v28 }
 0x3f1   : > { %2596 = vrcp.f32 %v1775_v42  ;;  %v3224_v49 = vadd.f32 1.0, %v2593_v44  ;;  %v1804_v17 = vand.u32 2147483647, %v1775_v42  ;;  %v1806_v27 = vand.u32 2147483648, %v1775_v42 }
 0x3f2   : > { %2598 = vrcp.f32 %v1774_v46  ;;  %v1789_v58 = vand.u32 2147483647, %v1774_v46  ;;  %v1791_v59 = vand.u32 2147483648, %v1774_v46  ;;  %vm1800_vm1 = vweird.f32 %v1775_v42 }
 0x3f3   : > { %2600 = vpow2.f32 %v2423_v29  ;;  %vm1785_vm5 = vweird.f32 %v1774_v46  ;;  %vm3237_vm14 = vcmp.eq.f32.partialorder %v1804_v17, 8.507059e+37  ;;  %v1807_v3 = vor.u32 1.1754944e-38, %v1806_v27 }
 0x3f4   : > { %2602 = vpow2.f32 %v2425_v40  ;;  %v1819_v45 = vand.u32 2147483647, %v3224_v49  ;;  %v1821_v48 = vand.u32 2147483648, %v3224_v49  ;;  %vm3247_vm15 = vcmp.eq.f32.partialorder %v1789_v58, 8.507059e+37 }
 0x3f5   : > { %2604 = vrcp.f32 %v3224_v49  ;;  %v1792_v39 = vor.u32 1.1754944e-38, %v1791_v59  ;;  %vm1815_vm4 = vweird.f32 %v3224_v49  ;;  %v1923_v36 = vpop.permute.xlu2 %1922 }
 0x3f6   : > { %v2595_v51 = vpop.eup %2594  ;;  %vm3262_vm6 = vcmp.eq.f32.partialorder %v1819_v45, 8.507059e+37  ;;  %v1822_v13 = vor.u32 1.1754944e-38, %v1821_v48 }
 0x3f7   : > { %v2597_v1 = vpop.eup %2596  ;;  %v3233_v60 = vadd.f32 1.0, %v2595_v51 }
 0x3f8   : > { %v2599_v61 = vpop.eup %2598  ;;  %v1796_v63 = vmul.f32 %v2597_v1, %v1775_v42  ;;  %vm1801_vm0 = vweird.f32 %v2597_v1 }
 0x3f9   : > { %v2601_v2 = vpop.eup %2600  ;;  %v1781_v25 = vmul.f32 %v2599_v61, %v1774_v46  ;;  %2606 = vrcp.f32 %v3233_v60  ;;  %vm1786_vm3 = vweird.f32 %v2599_v61  ;;  %vm1802_vm7 = vmor %vm1800_vm1, %vm1801_vm0  ;;  %vm1845_vm8 = vweird.f32 %v3233_v60 }
 0x3fa   : > { %v2603_v31 = vpop.eup %2602  ;;  %v1797_v35 = vsub.f32 1.0, %v1796_v63  ;;  %v3245_v5 = vadd.f32 1.0, %v2601_v2  ;;  %v1849_v41 = vand.u32 2147483647, %v3233_v60  ;;  %v1851_v43 = vand.u32 2147483648, %v3233_v60  ;;  %vm1787_vm9 = vmor %vm1785_vm5, %vm1786_vm3 }
 0x3fb   : > { %v2605_v7 = vpop.eup %2604  ;;  %v1782_v8 = vsub.f32 1.0, %v1781_v25  ;;  %v3251_v50 = vadd.f32 1.0, %v2603_v31 }
 0x3fc   : > { %v1798_v52 = vmul.f32 %v2597_v1, %v1797_v35  ;;  %v1811_v57 = vmul.f32 %v2605_v7, %v3224_v49  ;;  %2608 = vrcp.f32 %v3245_v5  ;;  %vm1816_vm10 = vweird.f32 %v2605_v7 }
 0x3fd   : > { %v1783_v56 = vmul.f32 %v2599_v61, %v1782_v8  ;;  %2610 = vrcp.f32 %v3251_v50  ;;  %v1864_v20 = vand.u32 2147483647, %v3251_v50  ;;  %v1866_v24 = vand.u32 2147483648, %v3251_v50  ;;  %vm1817_vm13 = vmor %vm1815_vm4, %vm1816_vm10 }
 0x3fe   : > { %v1799_v9 = vadd.f32 %v2597_v1, %v1798_v52  ;;  %v1812_v10 = vsub.f32 1.0, %v1811_v57  ;;  %vm1860_vm12 = vweird.f32 %v3251_v50  ;;  %vm3287_vm2 = vcmp.eq.f32.partialorder %v1849_v41, 8.507059e+37 }
 0x3ff   : > { %v2607_v38 = vpop.eup %2606  ;;  %v1784_v47 = vadd.f32 %v2599_v61, %v1783_v56  ;;  %v1834_v58 = vand.u32 2147483647, %v3245_v5  ;;  %v1836_v63 = vand.u32 2147483648, %v3245_v5 }
 0x400   : > { %v1803_v14 = vsel %vm1802_vm7, %v2597_v1, %v1799_v9  ;;  %v1813_v0 = vmul.f32 %v2605_v7, %v1812_v10  ;;  %v1841_v16 = vmul.f32 %v2607_v38, %v3233_v60  ;;  %vm1846_vm11 = vweird.f32 %v2607_v38  ;;  %v1918_v25 = vpop.permute.xlu0 %1917  ;;  %v1987_v60 = vpop.f32.mrf.mxu2 }
 0x401   : > { %v1808_v15 = vsel %vm3237_vm14, %v1807_v3, %v1803_v14  ;;  %v1788_v18 = vsel %vm1787_vm9, %v2599_v61, %v1784_v47  ;;  %vm1847_vm14 = vmor %vm1845_vm8, %vm1846_vm11  ;;  %v1852_v3 = vor.u32 1.1754944e-38, %v1851_v43  ;;  %v1985_v52 = vadd.f32 %v1984_v19, %v1918_v25 }
 0x402   : > { %v2609_v26 = vpop.eup %2608  ;;  %v1871_v23 = vmul.f32 %v1808_v15, %v3111_v12  ;;  %v1793_v28 = vsel %vm3247_vm15, %v1792_v39, %v1788_v18  ;;  %v1814_v30 = vadd.f32 %v2605_v7, %v1813_v0  ;;  %v1842_v34 = vsub.f32 1.0, %v1841_v16 }
 0x403   : > { %v2611_v37 = vpop.eup %2610  ;;  %v1870_v42 = vmul.f32 %v1793_v28, %v3106_v4  ;;  %v1826_v29 = vmul.f32 %v2609_v26, %v3245_v5  ;;  %vm1831_vm1 = vweird.f32 %v2609_v26  ;;  %vm1830_vm15 = vweird.f32 %v3245_v5 }
 0x404   : > { %v1991_v12 = vadd.f32 %v3229_v54, %v1871_v23  ;;  %v1818_v46 = vsel %vm1817_vm13, %v2605_v7, %v1814_v30  ;;  %v1856_v40 = vmul.f32 %v2611_v37, %v3251_v50  ;;  %v1843_v27 = vmul.f32 %v2607_v38, %v1842_v34  ;;  %vm1832_vm0 = vmor %vm1830_vm15, %vm1831_vm1 }
 0x405   : > { %v1990_v17 = vadd.f32 %v3227_v32, %v1870_v42  ;;  %v1823_v4 = vsel %vm3262_vm6, %v1822_v13, %v1818_v46  ;;  %v1827_v49 = vsub.f32 1.0, %v1826_v29  ;;  %vm1861_vm5 = vweird.f32 %v2611_v37 }
 0x406   : > { %v1997_v51 = vmax.f32 %v1991_v12, 0.0  ;;  %v1872_v1 = vmul.f32 %v1823_v4, %v3122_v22  ;;  %v1857_v54 = vsub.f32 1.0, %v1856_v40  ;;  %v1844_v32 = vadd.f32 %v2607_v38, %v1843_v27  ;;  %v1913_v8 = vpop.permute.xlu1 %1912  ;;  %vm1862_vm3 = vmor %vm1860_vm12, %vm1861_vm5 }
 0x407   : > { %v1996_v59 = vmax.f32 %v1990_v17, 0.0  ;;  %v1828_v61 = vmul.f32 %v2609_v26, %v1827_v49  ;;  %v1867_v22 = vor.u32 1.1754944e-38, %v1866_v24  ;;  %v1837_v7 = vor.u32 1.1754944e-38, %v1836_v63 }
 0x408   : > { %v1992_v2 = vadd.f32 %v3235_v62, %v1872_v1  ;;  %2003 = vst [vmem:[%s3299_s22 + $0x8] sm:$0xff] %v1997_v51  ;;  %v1858_v21 = vmul.f32 %v2611_v37, %v1857_v54  ;;  %v1848_v31 = vsel %vm1847_vm14, %v2607_v38, %v1844_v32  ;;  %vm1835_vm4 = vcmp.eq.f32.partialorder %v1834_v58, 8.507059e+37 }
 0x409   : > { %2002 = vst [vmem:[%s3299_s22] sm:$0xff] %v1996_v59  ;;  %v1829_v35 = vadd.f32 %v2609_v26, %v1828_v61  ;;  %v1853_v62 = vsel %vm3287_vm2, %v1852_v3, %v1848_v31  ;;  %vm1865_vm6 = vcmp.eq.f32.partialorder %v1864_v20, 8.507059e+37  ;;  %v1982_v13 = vadd.f32 %v3231_v55, %v1913_v8 }
 0x40a   : > { %v1998_v45 = vmax.f32 %v1992_v2, 0.0  ;;  %v1859_v48 = vadd.f32 %v2611_v37, %v1858_v21  ;;  %v1874_v39 = vmul.f32 %v1853_v62, %v3136_v33  ;;  %v1988_v38 = vadd.f32 %v1987_v60, %v1923_v36 }
 0x40b   : > { %v1833_v5 = vsel %vm1832_vm0, %v2609_v26, %v1829_v35 }
 0x40c   : > { %v1863_v57 = vsel %vm1862_vm3, %v2611_v37, %v1859_v48  ;;  %2004 = vst [vmem:[%s3299_s22 + $0x10] sm:$0xff] %v1998_v45  ;;  %v1838_v56 = vsel %vm1835_vm4, %v1837_v7, %v1833_v5  ;;  %v1994_v10 = vadd.f32 %v1985_v52, %v1874_v39 }
 0x40d   : > { %v1868_v9 = vsel %vm1865_vm6, %v1867_v22, %v1863_v57  ;;  %v1873_v11 = vmul.f32 %v1838_v56, %v3130_v53 }
 0x40e   : > { %v1875_v50 = vmul.f32 %v1868_v9, %v3141_v6  ;;  %v2000_v33 = vmax.f32 %v1994_v10, 0.0 }
 0x40f   : > { %v1993_v47 = vadd.f32 %v1982_v13, %v1873_v11 }
 0x410   : > { %v1995_v41 = vadd.f32 %v1988_v38, %v1875_v50  ;;  %2006 = vst [vmem:[%s3299_s22 + $0x20] sm:$0xff] %v2000_v33 }
 0x411   : > { %v1999_v43 = vmax.f32 %v1993_v47, 0.0 }
 0x412   : > { %v2001_v14 = vmax.f32 %v1995_v41, 0.0 }
 0x413   : > { %2005 = vst [vmem:[%s3299_s22 + $0x18] sm:$0xff] %v1999_v43 }
 0x414   : > { %2007 = vst [vmem:[%s3299_s22 + $0x28] sm:$0xff] %v2001_v14 }
 0x415 PF: > { %s21_s17 = sadd.s32 1, %s2618_s17  }
 0x416   : > { %p18_p5 = scmp.ge.s32.totalorder %s21_s17, 4  }
 0x418   :  { %20 = sbr.rel (!%p18_p5) target bundleno = 1 (0x1), region = 107 }

</bundles_post_ra>
